<compile_context>
chip_gen: v7x
topology: tpu7x:2x2x1
jax: 0.10.0
libtpu: 0.0.40
codegen_flags: <defaults>
</compile_context>

<pallas_src>
import functools

import jax
import jax.numpy as jnp
from jax.experimental import pallas as pl
from jax.experimental.pallas import tpu as pltpu

NEG_SLOPE = 0.01  # nn.LeakyReLU() default negative_slope


# ---------------------------------------------------------------------------
# Tiling helper
# ---------------------------------------------------------------------------
def _choose_tiling(M, target=512):
    """Return (tm, Mp).

    Prefers a power-of-two tm that divides M (no remainder pad / slice), at
    least 16 rows (bf16 packs 16 sublanes per vreg), and >= 2 grid tiles when
    M >= 32 so v7x's 2 TensorCores both get work via the "parallel" grid axis.
    """
    if M < 16:
        return 16, 16                       # single padded 16-row tile
    Mp = ((M + 15) // 16) * 16
    tm = 16
    while tm * 2 <= min(target, Mp) and Mp % (tm * 2) == 0:
        tm *= 2
    if tm == Mp and Mp >= 32:
        tm //= 2                            # keep >= 2 tiles (v7x megacore)
    return tm, Mp


# ---------------------------------------------------------------------------
# Pallas kernel: fused matmul (bf16 in, f32 acc) + bias + optional LeakyReLU
# ---------------------------------------------------------------------------
def _matmul_bias_act_kernel(x_ref, w_ref, b_ref, o_ref, *, negative_slope):
    acc = jnp.dot(x_ref[...], w_ref[...], preferred_element_type=jnp.float32)
    acc = acc + b_ref[...]                        # bias / activation in f32 (VPU)
    if negative_slope is not None:
        acc = jnp.where(acc >= 0.0, acc, acc * negative_slope)
    o_ref[...] = acc.astype(o_ref.dtype)          # bf16 store (lane-dense N)


def matmul_bias_act(x, w, b, *, negative_slope=None, out_dtype=jnp.bfloat16,
                    tm_target=512):
    """act(x @ w + b).  x: (M, K) bf16, w: (K, N) bf16 with N % 128 == 0
    (pre-padded once at init), b: (1, N) f32.  Returns (M, N) out_dtype."""
    M, K = x.shape
    Kw, N = w.shape
    assert K == Kw and b.shape == (1, N) and N % 128 == 0

    tm, Mp = _choose_tiling(M, tm_target)
    if Mp != M:                                   # only hits odd / tiny M
        x = jnp.pad(x, ((0, Mp - M), (0, 0)))

    out = pl.pallas_call(
        functools.partial(_matmul_bias_act_kernel, negative_slope=negative_slope),
        out_shape=jax.ShapeDtypeStruct((Mp, N), out_dtype),
        grid_spec=pltpu.PrefetchScalarGridSpec(
            num_scalar_prefetch=0,
            grid=(Mp // tm,),
            in_specs=[
                pl.BlockSpec((tm, K), lambda i: (i, 0)),   # patch tile (bf16)
                pl.BlockSpec((K, N), lambda i: (0, 0)),    # resident weight
                pl.BlockSpec((1, N), lambda i: (0, 0)),    # bias row (f32)
            ],
            out_specs=pl.BlockSpec((tm, N), lambda i: (i, 0)),
        ),
        compiler_params=pltpu.CompilerParams(
            dimension_semantics=("parallel",),    # shard M tiles across v7x TCs
        ),
    )(x, w, b)
    return out if Mp == M else out[:M]


# ---------------------------------------------------------------------------
# Pallas kernel: Linear(K, 1) head as a VPU mul + lane reduction (no N padding)
# ---------------------------------------------------------------------------
def _gemv_bias_kernel(x_ref, w_ref, b_ref, o_ref):
    prod = x_ref[...].astype(jnp.float32) * w_ref[...].astype(jnp.float32)
    o_ref[...] = jnp.sum(prod, axis=-1, keepdims=True) + b_ref[...]


def linear_gemv(x, w_row, b):
    """x @ w_row.T + b.  x: (M, K) bf16, w_row: (1, K) bf16 (PyTorch Linear
    layout), b: (1, 1) f32.  Returns (M, 1) f32."""
    M, K = x.shape
    assert w_row.shape == (1, K) and b.shape == (1, 1)
    tm, Mp = _choose_tiling(M, 256)
    if Mp != M:
        x = jnp.pad(x, ((0, Mp - M), (0, 0)))
    out = pl.pallas_call(
        _gemv_bias_kernel,
        out_shape=jax.ShapeDtypeStruct((Mp, 1), jnp.float32),
        grid_spec=pltpu.PrefetchScalarGridSpec(
            num_scalar_prefetch=0,
            grid=(Mp // tm,),
            in_specs=[
                pl.BlockSpec((tm, K), lambda i: (i, 0)),
                pl.BlockSpec((1, K), lambda i: (0, 0)),
                pl.BlockSpec((1, 1), lambda i: (0, 0)),
            ],
            out_specs=pl.BlockSpec((tm, 1), lambda i: (i, 0)),
        ),
        compiler_params=pltpu.CompilerParams(dimension_semantics=("parallel",)),
    )(x, w_row, b)
    return out if Mp == M else out[:M]


# ---------------------------------------------------------------------------
# Layer wrapper (spatial padding / strided im2col / reshape are XLA glue)
# ---------------------------------------------------------------------------
def conv3x3_s2_leaky_relu(x, w_mat, b_row):
    """3x3 conv, stride 2, padding 1, fused LeakyReLU.
    x: (N, H, W, Cin) bf16 (Cin may already include zero lane-padding);
    w_mat: (9*Cin, Cout) bf16, Cout % 128 == 0; b_row: (1, Cout) f32.
    Output: (N, Ho, Wo, Cout) bf16 (lane padding, if any, stays in place)."""
    N, H, W, Cin = x.shape
    assert w_mat.shape[0] == 9 * Cin
    Cout = w_mat.shape[1]
    Ho = (H + 2 - 3) // 2 + 1
    Wo = (W + 2 - 3) // 2 + 1
    xp = jnp.pad(x, ((0, 0), (1, 1), (1, 1), (0, 0)))          # bf16 pad
    # TODO(synk): fuse this strided im2col into the kernel (halo/phase tiles).
    cols = [xp[:, ky:ky + 2 * Ho - 1:2, kx:kx + 2 * Wo - 1:2, :]
            for ky in range(3) for kx in range(3)]
    patches = jnp.concatenate(cols, axis=-1).reshape(N * Ho * Wo, 9 * Cin)
    out = matmul_bias_act(patches, w_mat, b_row,
                          negative_slope=NEG_SLOPE, out_dtype=jnp.bfloat16)
    return out.reshape(N, Ho, Wo, Cout)


# ---------------------------------------------------------------------------
# Parameters (padded ONCE here, never per-forward) + forward
# ---------------------------------------------------------------------------
def init_discriminator_params(key, dim=64):
    """Deterministic synthetic params in the exact layout the kernels consume:
      conv i : W (9*cin_pad, cout_pad) bf16 im2col matrix (zero rows/cols in
               the lane padding), bias (1, cout_pad) f32.
      linear : W (1, 4*4*4*dim) bf16 row (PyTorch nn.Linear layout), b (1,1) f32.
    cout is rounded up to a multiple of 128 so every kernel store is lane-dense;
    the padded channels of one layer feed the (zero) extra K rows of the next,
    so no activation is sliced or re-padded between layers."""
    def rup128(c):
        return ((c + 127) // 128) * 128

    convs = []
    cin, cin_pad = 3, 3                       # conv1 input channels unpadded (K=27)
    for cout in (dim, 2 * dim, 4 * dim):
        cout_pad = rup128(cout)
        key, kw, kb = jax.random.split(key, 3)
        fan_in = 9 * cin
        w = (jax.random.normal(kw, (9, cin, cout), jnp.float32)
             * jnp.sqrt(2.0 / fan_in))
        b = jax.random.normal(kb, (cout,), jnp.float32) * 0.01
        w_pad = jnp.zeros((9, cin_pad, cout_pad), jnp.float32)
        w_pad = w_pad.at[:, :cin, :cout].set(w)
        w_pad = w_pad.reshape(9 * cin_pad, cout_pad).astype(jnp.bfloat16)
        b_pad = jnp.zeros((1, cout_pad), jnp.float32).at[0, :cout].set(b)
        convs.append((w_pad, b_pad))
        cin, cin_pad = cout, cout_pad

    key, kw, kb = jax.random.split(key, 3)
    k_lin = 4 * 4 * 4 * dim
    wl = (jax.random.normal(kw, (1, k_lin), jnp.float32)
          * jnp.sqrt(1.0 / k_lin)).astype(jnp.bfloat16)
    bl = jax.random.normal(kb, (1, 1), jnp.float32) * 0.01
    return {"convs": convs, "linear": (wl, bl)}


def discriminator_wgan_forward(x_nchw, params):
    # Cast to bf16 BEFORE the 9x im2col inflation, then NCHW -> NHWC.
    x = jnp.transpose(x_nchw.astype(jnp.bfloat16), (0, 2, 3, 1))
    for w_mat, b_row in params["convs"]:
        x = conv3x3_s2_leaky_relu(x, w_mat, b_row)
    wl, bl = params["linear"]
    n, h, w, c = x.shape
    c_used = wl.shape[1] // (h * w)          # logical channels of the last conv
    if c != c_used:                          # only if the last Cout was padded
        x = x[..., :c_used]                  # (no-op for DIM=64: 256 % 128 == 0)
    # match PyTorch's view(-1, 4*4*4*DIM) on an NCHW tensor
    flat = jnp.transpose(x, (0, 3, 1, 2)).reshape(n, -1)
    return linear_gemv(flat, wl, bl)


# ---------------------------------------------------------------------------
# Pure-JAX (XLA) reference mirroring the bf16 quantization points
# ---------------------------------------------------------------------------
def _reference_forward(x_nchw, params):
    x = jnp.transpose(x_nchw.astype(jnp.bfloat16).astype(jnp.float32),
                      (0, 2, 3, 1))
    for w_mat, b_row in params["convs"]:
        cout = w_mat.shape[1]
        cin = w_mat.shape[0] // 9
        wf = w_mat.astype(jnp.float32).reshape(3, 3, cin, cout)       # HWIO
        x = jax.lax.conv_general_dilated(
            x, wf, window_strides=(2, 2), padding=((1, 1), (1, 1)),
            dimension_numbers=("NHWC", "HWIO", "NHWC"))
        x = x + b_row.reshape(1, 1, 1, cout)
        x = jnp.where(x >= 0.0, x, NEG_SLOPE * x)
        x = x.astype(jnp.bfloat16).astype(jnp.float32)                # bf16 acts
    wl, bl = params["linear"]
    n, h, w, c = x.shape
    c_used = wl.shape[1] // (h * w)
    if c != c_used:
        x = x[..., :c_used]
    flat = jnp.transpose(x, (0, 3, 1, 2)).reshape(n, -1)
    return flat @ wl.astype(jnp.float32).T + bl


# ---------------------------------------------------------------------------
if __name__ == "__main__":
    key = jax.random.PRNGKey(0)
    k_params, k_x = jax.random.split(key)

    DIM = 64
    params = init_discriminator_params(k_params, dim=DIM)

    # Linear(4*4*4*DIM) implies 32x32 inputs (32 -> 16 -> 8 -> 4 spatial).
    # NOTE: at batch 2 the forward is pallas_call/glue overhead-bound; tune
    # tm / fusion decisions at realistic batch (>= 64) where layers are mem-bound.
    x = jax.random.normal(k_x, (2, 3, 32, 32), jnp.float32)

    fwd = jax.jit(discriminator_wgan_forward)
    out = jax.block_until_ready(fwd(x, params))
    assert out.shape == (2, 1), out.shape
    assert bool(jnp.all(jnp.isfinite(out))), out

    # Validate bf16-MXU / f32-accumulate kernels against the XLA reference.
    ref = _reference_forward(x, params)
    err = float(jnp.max(jnp.abs(out - ref)))
    tol = 5e-2 + 5e-2 * float(jnp.max(jnp.abs(ref)))
    assert err < tol, f"kernel vs reference mismatch: {err} (tol {tol})"

    print("KERNEL_OK")
</pallas_src>

<mosaic_0001>
module attributes {stable_mosaic.version = 11 : i64} {
  func.func @_matmul_bias_act_kernel(%arg0: i32, %arg1: memref<256x27xbf16, #tpu.memory_space<vmem>>, %arg2: memref<27x128xbf16, #tpu.memory_space<vmem>>, %arg3: memref<1x128xf32, #tpu.memory_space<vmem>>, %arg4: memref<256x128xbf16, #tpu.memory_space<vmem>>) attributes {dimension_semantics = [#tpu.dimension_semantics<parallel>], iteration_bounds = array<i64: 2>, scalar_prefetch = 0 : i64, scratch_operands = 0 : i64, tpu.core_type = #tpu.core_type<tc>, window_params = [{transform_indices = @transform_0, window_bounds = array<i64: 256, 27>}, {pipeline_mode = #tpu.pipeline_mode<synchronous>, transform_indices = @transform_1, window_bounds = array<i64: 27, 128>}, {pipeline_mode = #tpu.pipeline_mode<synchronous>, transform_indices = @transform_2, window_bounds = array<i64: 1, 128>}, {transform_indices = @transform_3, window_bounds = array<i64: 256, 128>}]} {
    %c0 = arith.constant 0 : index
    %c0_0 = arith.constant 0 : index
    %0 = vector.load %arg1[%c0, %c0_0] : memref<256x27xbf16, #tpu.memory_space<vmem>>, vector<256x27xbf16>
    %c0_1 = arith.constant 0 : index
    %c0_2 = arith.constant 0 : index
    %1 = vector.load %arg2[%c0_1, %c0_2] : memref<27x128xbf16, #tpu.memory_space<vmem>>, vector<27x128xbf16>
    %cst = arith.constant dense<0.000000e+00> : vector<256x128xf32>
    %2 = tpu.matmul %0, %1, %cst {dimension_numbers = #tpu.dot_dimension_numbers<[1], [0], [0], [1], [0, 0, 1, 1], [], []>} : vector<256x27xbf16>, vector<27x128xbf16>, vector<256x128xf32> -> vector<256x128xf32>
    %c0_3 = arith.constant 0 : index
    %c0_4 = arith.constant 0 : index
    %3 = vector.load %arg3[%c0_3, %c0_4] : memref<1x128xf32, #tpu.memory_space<vmem>>, vector<1x128xf32>
    %4 = vector.broadcast %3 : vector<1x128xf32> to vector<256x128xf32>
    %5 = arith.addf %2, %4 : vector<256x128xf32>
    %cst_5 = arith.constant 0.000000e+00 : f32
    %6 = vector.broadcast %cst_5 : f32 to vector<256x128xf32>
    %7 = arith.cmpf oge, %5, %6 : vector<256x128xf32>
    %cst_6 = arith.constant 0.00999999977 : f32
    %8 = vector.broadcast %cst_6 : f32 to vector<256x128xf32>
    %9 = arith.mulf %5, %8 : vector<256x128xf32>
    %10 = arith.select %7, %5, %9 : vector<256x128xi1>, vector<256x128xf32>
    %11 = arith.truncf %10 : vector<256x128xf32> to vector<256x128xbf16>
    %c0_7 = arith.constant 0 : index
    %c0_8 = arith.constant 0 : index
    %12 = vector.load %arg4[%c0_7, %c0_8] : memref<256x128xbf16, #tpu.memory_space<vmem>>, vector<256x128xbf16>
    tpu.vector_store %arg4[%c0_7, %c0_8], %11 {strides = array<i32>} : memref<256x128xbf16, #tpu.memory_space<vmem>>, vector<256x128xbf16>,
    return
  }
  func.func @transform_0(%arg0: i32) -> (i32, i32) {
    %c0_i32 = arith.constant 0 : i32
    %c0_i32_0 = arith.constant 0 : i32
    return %arg0, %c0_i32 : i32, i32
  }
  func.func @transform_1(%arg0: i32) -> (i32, i32) {
    %c0_i32 = arith.constant 0 : i32
    %c0_i32_0 = arith.constant 0 : i32
    %c0_i32_1 = arith.constant 0 : i32
    return %c0_i32, %c0_i32_0 : i32, i32
  }
  func.func @transform_2(%arg0: i32) -> (i32, i32) {
    %c0_i32 = arith.constant 0 : i32
    %c0_i32_0 = arith.constant 0 : i32
    %c0_i32_1 = arith.constant 0 : i32
    return %c0_i32, %c0_i32_0 : i32, i32
  }
  func.func @transform_3(%arg0: i32) -> (i32, i32) {
    %c0_i32 = arith.constant 0 : i32
    %c0_i32_0 = arith.constant 0 : i32
    return %arg0, %c0_i32 : i32, i32
  }
}

module attributes {stable_mosaic.version = 11 : i64} {
  func.func @_matmul_bias_act_kernel(%arg0: i32, %arg1: memref<64x1152xbf16, #tpu.memory_space<vmem>>, %arg2: memref<1152x128xbf16, #tpu.memory_space<vmem>>, %arg3: memref<1x128xf32, #tpu.memory_space<vmem>>, %arg4: memref<64x128xbf16, #tpu.memory_space<vmem>>) attributes {dimension_semantics = [#tpu.dimension_semantics<parallel>], iteration_bounds = array<i64: 2>, scalar_prefetch = 0 : i64, scratch_operands = 0 : i64, tpu.core_type = #tpu.core_type<tc>, window_params = [{transform_indices = @transform_0, window_bounds = array<i64: 64, 1152>}, {pipeline_mode = #tpu.pipeline_mode<synchronous>, transform_indices = @transform_1, window_bounds = array<i64: 1152, 128>}, {pipeline_mode = #tpu.pipeline_mode<synchronous>, transform_indices = @transform_2, window_bounds = array<i64: 1, 128>}, {transform_indices = @transform_3, window_bounds = array<i64: 64, 128>}]} {
    %c0 = arith.constant 0 : index
    %c0_0 = arith.constant 0 : index
    %0 = vector.load %arg1[%c0, %c0_0] : memref<64x1152xbf16, #tpu.memory_space<vmem>>, vector<64x1152xbf16>
    %c0_1 = arith.constant 0 : index
    %c0_2 = arith.constant 0 : index
    %1 = vector.load %arg2[%c0_1, %c0_2] : memref<1152x128xbf16, #tpu.memory_space<vmem>>, vector<1152x128xbf16>
    %cst = arith.constant dense<0.000000e+00> : vector<64x128xf32>
    %2 = tpu.matmul %0, %1, %cst {dimension_numbers = #tpu.dot_dimension_numbers<[1], [0], [0], [1], [0, 0, 1, 1], [], []>} : vector<64x1152xbf16>, vector<1152x128xbf16>, vector<64x128xf32> -> vector<64x128xf32>
    %c0_3 = arith.constant 0 : index
    %c0_4 = arith.constant 0 : index
    %3 = vector.load %arg3[%c0_3, %c0_4] : memref<1x128xf32, #tpu.memory_space<vmem>>, vector<1x128xf32>
    %4 = vector.broadcast %3 : vector<1x128xf32> to vector<64x128xf32>
    %5 = arith.addf %2, %4 : vector<64x128xf32>
    %cst_5 = arith.constant 0.000000e+00 : f32
    %6 = vector.broadcast %cst_5 : f32 to vector<64x128xf32>
    %7 = arith.cmpf oge, %5, %6 : vector<64x128xf32>
    %cst_6 = arith.constant 0.00999999977 : f32
    %8 = vector.broadcast %cst_6 : f32 to vector<64x128xf32>
    %9 = arith.mulf %5, %8 : vector<64x128xf32>
    %10 = arith.select %7, %5, %9 : vector<64x128xi1>, vector<64x128xf32>
    %11 = arith.truncf %10 : vector<64x128xf32> to vector<64x128xbf16>
    %c0_7 = arith.constant 0 : index
    %c0_8 = arith.constant 0 : index
    %12 = vector.load %arg4[%c0_7, %c0_8] : memref<64x128xbf16, #tpu.memory_space<vmem>>, vector<64x128xbf16>
    tpu.vector_store %arg4[%c0_7, %c0_8], %11 {strides = array<i32>} : memref<64x128xbf16, #tpu.memory_space<vmem>>, vector<64x128xbf16>,
    return
  }
  func.func @transform_0(%arg0: i32) -> (i32, i32) {
    %c0_i32 = arith.constant 0 : i32
    %c0_i32_0 = arith.constant 0 : i32
    return %arg0, %c0_i32 : i32, i32
  }
  func.func @transform_1(%arg0: i32) -> (i32, i32) {
    %c0_i32 = arith.constant 0 : i32
    %c0_i32_0 = arith.constant 0 : i32
    %c0_i32_1 = arith.constant 0 : i32
    return %c0_i32, %c0_i32_0 : i32, i32
  }
  func.func @transform_2(%arg0: i32) -> (i32, i32) {
    %c0_i32 = arith.constant 0 : i32
    %c0_i32_0 = arith.constant 0 : i32
    %c0_i32_1 = arith.constant 0 : i32
    return %c0_i32, %c0_i32_0 : i32, i32
  }
  func.func @transform_3(%arg0: i32) -> (i32, i32) {
    %c0_i32 = arith.constant 0 : i32
    %c0_i32_0 = arith.constant 0 : i32
    return %arg0, %c0_i32 : i32, i32
  }
}

module attributes {stable_mosaic.version = 11 : i64} {
  func.func @_matmul_bias_act_kernel(%arg0: i32, %arg1: memref<16x1152xbf16, #tpu.memory_space<vmem>>, %arg2: memref<1152x256xbf16, #tpu.memory_space<vmem>>, %arg3: memref<1x256xf32, #tpu.memory_space<vmem>>, %arg4: memref<16x256xbf16, #tpu.memory_space<vmem>>) attributes {dimension_semantics = [#tpu.dimension_semantics<parallel>], iteration_bounds = array<i64: 2>, scalar_prefetch = 0 : i64, scratch_operands = 0 : i64, tpu.core_type = #tpu.core_type<tc>, window_params = [{transform_indices = @transform_0, window_bounds = array<i64: 16, 1152>}, {pipeline_mode = #tpu.pipeline_mode<synchronous>, transform_indices = @transform_1, window_bounds = array<i64: 1152, 256>}, {pipeline_mode = #tpu.pipeline_mode<synchronous>, transform_indices = @transform_2, window_bounds = array<i64: 1, 256>}, {transform_indices = @transform_3, window_bounds = array<i64: 16, 256>}]} {
    %c0 = arith.constant 0 : index
    %c0_0 = arith.constant 0 : index
    %0 = vector.load %arg1[%c0, %c0_0] : memref<16x1152xbf16, #tpu.memory_space<vmem>>, vector<16x1152xbf16>
    %c0_1 = arith.constant 0 : index
    %c0_2 = arith.constant 0 : index
    %1 = vector.load %arg2[%c0_1, %c0_2] : memref<1152x256xbf16, #tpu.memory_space<vmem>>, vector<1152x256xbf16>
    %cst = arith.constant dense<0.000000e+00> : vector<16x256xf32>
    %2 = tpu.matmul %0, %1, %cst {dimension_numbers = #tpu.dot_dimension_numbers<[1], [0], [0], [1], [0, 0, 1, 1], [], []>} : vector<16x1152xbf16>, vector<1152x256xbf16>, vector<16x256xf32> -> vector<16x256xf32>
    %c0_3 = arith.constant 0 : index
    %c0_4 = arith.constant 0 : index
    %3 = vector.load %arg3[%c0_3, %c0_4] : memref<1x256xf32, #tpu.memory_space<vmem>>, vector<1x256xf32>
    %4 = vector.broadcast %3 : vector<1x256xf32> to vector<16x256xf32>
    %5 = arith.addf %2, %4 : vector<16x256xf32>
    %cst_5 = arith.constant 0.000000e+00 : f32
    %6 = vector.broadcast %cst_5 : f32 to vector<16x256xf32>
    %7 = arith.cmpf oge, %5, %6 : vector<16x256xf32>
    %cst_6 = arith.constant 0.00999999977 : f32
    %8 = vector.broadcast %cst_6 : f32 to vector<16x256xf32>
    %9 = arith.mulf %5, %8 : vector<16x256xf32>
    %10 = arith.select %7, %5, %9 : vector<16x256xi1>, vector<16x256xf32>
    %11 = arith.truncf %10 : vector<16x256xf32> to vector<16x256xbf16>
    %c0_7 = arith.constant 0 : index
    %c0_8 = arith.constant 0 : index
    %12 = vector.load %arg4[%c0_7, %c0_8] : memref<16x256xbf16, #tpu.memory_space<vmem>>, vector<16x256xbf16>
    tpu.vector_store %arg4[%c0_7, %c0_8], %11 {strides = array<i32>} : memref<16x256xbf16, #tpu.memory_space<vmem>>, vector<16x256xbf16>,
    return
  }
  func.func @transform_0(%arg0: i32) -> (i32, i32) {
    %c0_i32 = arith.constant 0 : i32
    %c0_i32_0 = arith.constant 0 : i32
    return %arg0, %c0_i32 : i32, i32
  }
  func.func @transform_1(%arg0: i32) -> (i32, i32) {
    %c0_i32 = arith.constant 0 : i32
    %c0_i32_0 = arith.constant 0 : i32
    %c0_i32_1 = arith.constant 0 : i32
    return %c0_i32, %c0_i32_0 : i32, i32
  }
  func.func @transform_2(%arg0: i32) -> (i32, i32) {
    %c0_i32 = arith.constant 0 : i32
    %c0_i32_0 = arith.constant 0 : i32
    %c0_i32_1 = arith.constant 0 : i32
    return %c0_i32, %c0_i32_0 : i32, i32
  }
  func.func @transform_3(%arg0: i32) -> (i32, i32) {
    %c0_i32 = arith.constant 0 : i32
    %c0_i32_0 = arith.constant 0 : i32
    return %arg0, %c0_i32 : i32, i32
  }
}

module attributes {stable_mosaic.version = 11 : i64} {
  func.func @_gemv_bias_kernel(%arg0: i32, %arg1: memref<16x4096xbf16, #tpu.memory_space<vmem>>, %arg2: memref<1x4096xbf16, #tpu.memory_space<vmem>>, %arg3: memref<1x1xf32, #tpu.memory_space<vmem>>, %arg4: memref<16x1xf32, #tpu.memory_space<vmem>>) attributes {dimension_semantics = [#tpu.dimension_semantics<parallel>], iteration_bounds = array<i64: 1>, scalar_prefetch = 0 : i64, scratch_operands = 0 : i64, tpu.core_type = #tpu.core_type<tc>, window_params = [{transform_indices = @transform_0, window_bounds = array<i64: 16, 4096>}, {pipeline_mode = #tpu.pipeline_mode<synchronous>, transform_indices = @transform_1, window_bounds = array<i64: 1, 4096>}, {pipeline_mode = #tpu.pipeline_mode<synchronous>, transform_indices = @transform_2, window_bounds = array<i64: 1, 1>}, {transform_indices = @transform_3, window_bounds = array<i64: 16, 1>}]} {
    %c0 = arith.constant 0 : index
    %c0_0 = arith.constant 0 : index
    %0 = vector.load %arg1[%c0, %c0_0] : memref<16x4096xbf16, #tpu.memory_space<vmem>>, vector<16x4096xbf16>
    %1 = arith.extf %0 : vector<16x4096xbf16> to vector<16x4096xf32>
    %c0_1 = arith.constant 0 : index
    %c0_2 = arith.constant 0 : index
    %2 = vector.load %arg2[%c0_1, %c0_2] : memref<1x4096xbf16, #tpu.memory_space<vmem>>, vector<1x4096xbf16>
    %3 = arith.extf %2 : vector<1x4096xbf16> to vector<1x4096xf32>
    %4 = vector.broadcast %3 : vector<1x4096xf32> to vector<16x4096xf32>
    %5 = arith.mulf %1, %4 : vector<16x4096xf32>
    %cst = arith.constant dense<0.000000e+00> : vector<16xf32>
    %6 = vector.multi_reduction <add>, %5, %cst [1] : vector<16x4096xf32> to vector<16xf32>
    %7 = vector.shape_cast %6 : vector<16xf32> to vector<16x1xf32>
    %c0_3 = arith.constant 0 : index
    %c0_4 = arith.constant 0 : index
    %8 = vector.load %arg3[%c0_3, %c0_4] : memref<1x1xf32, #tpu.memory_space<vmem>>, vector<1x1xf32>
    %9 = vector.broadcast %8 : vector<1x1xf32> to vector<16x1xf32>
    %10 = arith.addf %7, %9 : vector<16x1xf32>
    %c0_5 = arith.constant 0 : index
    %c0_6 = arith.constant 0 : index
    %11 = vector.load %arg4[%c0_5, %c0_6] : memref<16x1xf32, #tpu.memory_space<vmem>>, vector<16x1xf32>
    tpu.vector_store %arg4[%c0_5, %c0_6], %10 {strides = array<i32>} : memref<16x1xf32, #tpu.memory_space<vmem>>, vector<16x1xf32>,
    return
  }
  func.func @transform_0(%arg0: i32) -> (i32, i32) {
    %c0_i32 = arith.constant 0 : i32
    %c0_i32_0 = arith.constant 0 : i32
    return %arg0, %c0_i32 : i32, i32
  }
  func.func @transform_1(%arg0: i32) -> (i32, i32) {
    %c0_i32 = arith.constant 0 : i32
    %c0_i32_0 = arith.constant 0 : i32
    %c0_i32_1 = arith.constant 0 : i32
    return %c0_i32, %c0_i32_0 : i32, i32
  }
  func.func @transform_2(%arg0: i32) -> (i32, i32) {
    %c0_i32 = arith.constant 0 : i32
    %c0_i32_0 = arith.constant 0 : i32
    %c0_i32_1 = arith.constant 0 : i32
    return %c0_i32, %c0_i32_0 : i32, i32
  }
  func.func @transform_3(%arg0: i32) -> (i32, i32) {
    %c0_i32 = arith.constant 0 : i32
    %c0_i32_0 = arith.constant 0 : i32
    return %arg0, %c0_i32 : i32, i32
  }
}

</mosaic_0001>

<bundles_post_ra>
// kernel: discriminator_wgan_forward.4
= control target key start
LH: loop header
LB: loop body
LE: loop exit
PB: predicated region body
PF: predicated region fallthrough
CT: control target
= control target key end

     0   :  { %s1157_s12 = smov 0   ;;  %s1281_s0 = inlined_call_operand.vmem [shape: bf16[512,27], index: 0, kind: input, shape index: {}]   ;;  %s1282_s1 = inlined_call_operand.vmem [shape: bf16[27,128], index: 1, kind: input, shape index: {}]   ;;  %s1283_s2 = inlined_call_operand.vmem [shape: f32[1,128], index: 2, kind: input, shape index: {}]   ;;  %s1284_s3 = inlined_call_operand.vmem [shape: bf16[512,128], index: 3, kind: output, shape index: {}]  }
   0x1 LB: > { %s838_s13 = sadd.s32 4294967295, %s1134_s12   ;;  %p842_p0 = scmp.ge.s32.totalorder %s1134_s12, 1  ;;  %s1134_s12 = sphi %s1157_s12, %s13_s12  }
   0x2   : > { %p138_p1 = scmp.lt.s32.totalorder %s1134_s12, 3 }
   0x4   : > { %p139_p2 = pnand %p842_p0, %p138_p1 }
   0x5   : > { %v1110_v0 = vld [vmem:[%s1282_s1] sm:$0xff] (!%p139_p2)   ;;  %vm358_vm0 = vcmask (!%p139_p2), 1044480   ;;  %v1111_v1 = vld [vmem:[%s1282_s1 + $0x8] sm:$0x3f] (!%p139_p2)   ;;  %vm359_vm1 = vcmask (!%p139_p2), 1045504   ;;  %s843_s18 = sshll.u32 (!%p139_p2), %s838_s13, 5 }
   0x6   : > { %142 = sbr.rel (%p139_p2) target bundleno = 271 (0x10f), region = 32  ;;  %1061 = vmatprep.subr.bf16.mxu0 (!%p139_p2), %v1110_v0  ;;  %1097 = vmatprep.subr.bf16.mxu1 (!%p139_p2), %v1110_v0  ;;  %v1136_v2 = vmov (!%p139_p2), 65535   ;;  %p163_p3 = scmp.lt.s32.totalorder (!%p139_p2), %s843_s18, 63  ;;  %vm309_vm2 = vcmask (!%p139_p2), 220160   ;;  %v1216_v22 = vld [vmem:[%s1283_s2] ss:$0 sm:$0xff] (!%p139_p2) }
   0x7   : > { %1062 = vmatpush3.bf16.msra.mxu0 (!%p139_p2), %v1110_v0  ;;  %1099 = vmatpush3.bf16.msra.mxu1 (!%p139_p2), %v1110_v0  ;;  %v360_v3 = vsel (!%p139_p2), %vm358_vm0, 4294967295, %v1136_v2 }
   0x8   : > { %v361_v4 = vsel (!%p139_p2), %vm359_vm1, %v360_v3, 0 }
   0x9   : > { %v363_v5 = vand.u32 (!%p139_p2), %v1111_v1, %v361_v4 }
   0xb   : > { %1063 = vmatprep.subr.bf16.mxu0 (!%p139_p2), %v363_v5  ;;  %1098 = vmatprep.subr.bf16.mxu1 (!%p139_p2), %v363_v5 }
   0xc   : > { %1064 = vmatpush3.bf16.msra.mxu0 (!%p139_p2), %v363_v5  ;;  %1100 = vmatpush3.bf16.msra.mxu1 (!%p139_p2), %v363_v5 }
   0xd   : > { %s1286_s18 = smov (!%p163_p3, %s843_s18), 63 }
   0xe   : > { %s844_s19 = sshll.u32 %s1286_s18, 2 }
   0xf   : > { %s1179_s22 = scalar_lea.vmem %s1281_s0, %s844_s19  ;;  %s1231_s27 = scalar_lea.vmem %s1284_s3, %s844_s19 }
  0x10   : > { %v1112_v6 = vld [vmem:[%s1179_s22] sm:$0xff]   ;;  %v1114_v8 = vld [vmem:[%s1179_s22 + $0x8] sm:$0xff]   ;;  %v1116_v10 = vld [vmem:[%s1179_s22 + $0x10] sm:$0xff]  }
  0x11   : > { %v1113_v7 = vld [vmem:[%s1179_s22 + $0x40] sm:$0xff]   ;;  %1065 = vmatprep.mubr.msk.bf16.mxu0 %vm309_vm2, %v1112_v6  ;;  %v1115_v9 = vld [vmem:[%s1179_s22 + $0x48] sm:$0xff]   ;;  %v1117_v11 = vld [vmem:[%s1179_s22 + $0x50] sm:$0xff]  }
  0x12   : > { %1081 = vmatprep.mubr.msk.bf16.mxu1 %vm309_vm2, %v1113_v7  ;;  %1066 = vmatmul.mubr.msk.bf16.vlgmr.msra.gmra.mrb[0].mxu0 %vm309_vm2, %v1114_v8  ;;  %v1118_v12 = vld [vmem:[%s1179_s22 + $0x18] sm:$0xff]   ;;  %v1120_v14 = vld [vmem:[%s1179_s22 + $0x20] sm:$0xff]   ;;  %v1122_v16 = vld [vmem:[%s1179_s22 + $0x28] sm:$0xff]  }
  0x13   : > { %1082 = vmatmul.mubr.msk.bf16.vlgmr.msra.gmra.mrb[0].mxu1 %vm309_vm2, %v1115_v9  ;;  %1069 = vmatprep.mubr.msk.bf16.mxu0 %vm309_vm2, %v1116_v10  ;;  %v1119_v13 = vld [vmem:[%s1179_s22 + $0x58] sm:$0xff]   ;;  %v1121_v15 = vld [vmem:[%s1179_s22 + $0x60] sm:$0xff]   ;;  %v1123_v17 = vld [vmem:[%s1179_s22 + $0x68] sm:$0xff]  }
  0x14   : > { %1085 = vmatprep.mubr.msk.bf16.mxu1 %vm309_vm2, %v1117_v11  ;;  %v1124_v18 = vld [vmem:[%s1179_s22 + $0x30] sm:$0xff]   ;;  %v1126_v20 = vld [vmem:[%s1179_s22 + $0x38] sm:$0xff]  }
  0x15   : > { %v1125_v19 = vld [vmem:[%s1179_s22 + $0x70] sm:$0xff]   ;;  %v1127_v21 = vld [vmem:[%s1179_s22 + $0x78] sm:$0xff]  }
  0x1a   : > { %1070 = vmatmul.mubr.msk.bf16.gmra.mrb[4].mxu0 %vm309_vm2, %v1118_v12 }
  0x1b   : > { %1086 = vmatmul.mubr.msk.bf16.gmra.mrb[4].mxu1 %vm309_vm2, %v1119_v13  ;;  %1073 = vmatprep.mubr.msk.bf16.mxu0 %vm309_vm2, %v1120_v14 }
  0x1c   : > { %1089 = vmatprep.mubr.msk.bf16.mxu1 %vm309_vm2, %v1121_v15 }
  0x22   : > { %1074 = vmatmul.mubr.msk.bf16.gmra.mrb[8].mxu0 %vm309_vm2, %v1122_v16 }
  0x23   : > { %1090 = vmatmul.mubr.msk.bf16.gmra.mrb[8].mxu1 %vm309_vm2, %v1123_v17  ;;  %1077 = vmatprep.mubr.msk.bf16.mxu0 %vm309_vm2, %v1124_v18 }
  0x24   : > { %1093 = vmatprep.mubr.msk.bf16.mxu1 %vm309_vm2, %v1125_v19 }
  0x2a   : > { %1078 = vmatmul.mubr.msk.bf16.gmra.mrb[12].mxu0 %vm309_vm2, %v1126_v20 }
  0x2b   : > { %1094 = vmatmul.mubr.msk.bf16.gmra.mrb[12].mxu1 %vm309_vm2, %v1127_v21 }
  0xe5   : > { %v1067_v23 = vpop.f32.mrb[0].mxu0 }
  0xe6   : > { %v408_v24 = vadd.f32 %v1067_v23, %v1216_v22  ;;  %v1083_v25 = vpop.f32.mrb[0].mxu1  ;;  %v399_v26 = vpop.f32.mrb[1].mxu0 }
  0xe7   : > { %v472_v27 = vadd.f32 %v1083_v25, %v1216_v22  ;;  %v400_v28 = vadd.f32 %v1216_v22, %v399_v26  ;;  %v463_v29 = vpop.f32.mrb[1].mxu1  ;;  %v1068_v30 = vpop.f32.mrb[2].mxu0 }
  0xe8   : > { %vm528_vm3 = vcmp.ge.f32.partialorder %v408_v24, 0.0  ;;  %v560_v31 = vmul.f32 0.01, %v408_v24  ;;  %v464_v32 = vadd.f32 %v1216_v22, %v463_v29  ;;  %v411_v33 = vadd.f32 %v1068_v30, %v1216_v22  ;;  %v1084_v34 = vpop.f32.mrb[2].mxu1  ;;  %v402_v35 = vpop.f32.mrb[3].mxu0 }
  0xe9   : > { %vm544_vm4 = vcmp.ge.f32.partialorder %v472_v27, 0.0  ;;  %v576_v36 = vmul.f32 0.01, %v472_v27  ;;  %vm526_vm5 = vcmp.ge.f32.partialorder %v400_v28, 0.0  ;;  %v558_v37 = vmul.f32 0.01, %v400_v28 }
  0xea   : > { %vm542_vm6 = vcmp.ge.f32.partialorder %v464_v32, 0.0  ;;  %v574_v38 = vmul.f32 0.01, %v464_v32  ;;  %vm529_vm7 = vcmp.ge.f32.partialorder %v411_v33, 0.0  ;;  %v466_v39 = vpop.f32.mrb[3].mxu1  ;;  %v592_v40 = vsel %vm528_vm3, %v408_v24, %v560_v31 }
  0xeb   : > { %v561_v41 = vmul.f32 0.01, %v411_v33  ;;  %v475_v42 = vadd.f32 %v1084_v34, %v1216_v22  ;;  %v608_v43 = vsel %vm544_vm4, %v472_v27, %v576_v36  ;;  %v590_v44 = vsel %vm526_vm5, %v400_v28, %v558_v37 }
  0xec   : > { %v403_v45 = vadd.f32 %v1216_v22, %v402_v35  ;;  %v467_v46 = vadd.f32 %v1216_v22, %v466_v39  ;;  %v606_v47 = vsel %vm542_vm6, %v464_v32, %v574_v38 }
  0xed   : > { %v593_v48 = vsel %vm529_vm7, %v411_v33, %v561_v41  ;;  %vm545_vm8 = vcmp.ge.f32.partialorder %v475_v42, 0.0  ;;  %v577_v49 = vmul.f32 0.01, %v475_v42  ;;  %v1071_v50 = vpop.f32.mrb[4].mxu0 }
  0xee   : > { %v956_v51 = vpack.c.bf16 %v593_v48, %v592_v40  ;;  %vm527_vm9 = vcmp.ge.f32.partialorder %v403_v45, 0.0  ;;  %v559_v52 = vmul.f32 0.01, %v403_v45  ;;  %vm543_vm10 = vcmp.ge.f32.partialorder %v467_v46, 0.0  ;;  %v1087_v53 = vpop.f32.mrb[4].mxu1  ;;  %v415_v54 = vpop.f32.mrb[5].mxu0 }
  0xef   : > { %v609_v55 = vsel %vm545_vm8, %v475_v42, %v577_v49  ;;  %v575_v56 = vmul.f32 0.01, %v467_v46  ;;  %v424_v57 = vadd.f32 %v1071_v50, %v1216_v22  ;;  %v488_v58 = vadd.f32 %v1087_v53, %v1216_v22  ;;  %v479_v59 = vpop.f32.mrb[5].mxu1  ;;  %v1072_v60 = vpop.f32.mrb[6].mxu0 }
  0xf0   : > { %1028 = vst [vmem:[%s1231_s27 + $0x8] sm:$0xff] %v956_v51   ;;  %v996_v61 = vpack.c.bf16 %v609_v55, %v608_v43  ;;  %v591_v62 = vsel %vm527_vm9, %v403_v45, %v559_v52  ;;  %v416_v63 = vadd.f32 %v1216_v22, %v415_v54  ;;  %v480_v0 = vadd.f32 %v1216_v22, %v479_v59  ;;  %v1088_v1 = vpop.f32.mrb[6].mxu1  ;;  %v418_v2 = vpop.f32.mrb[7].mxu0 }
  0xf1   : > { %v951_v3 = vpack.c.bf16 %v591_v62, %v590_v44  ;;  %v607_v4 = vsel %vm543_vm10, %v467_v46, %v575_v56  ;;  %vm532_vm11 = vcmp.ge.f32.partialorder %v424_v57, 0.0  ;;  %v564_v5 = vmul.f32 0.01, %v424_v57  ;;  %v482_v6 = vpop.f32.mrb[7].mxu1 }
  0xf2   : > { %1036 = vst [vmem:[%s1231_s27 + $0x48] sm:$0xff] %v996_v61   ;;  %v991_v7 = vpack.c.bf16 %v607_v4, %v606_v47  ;;  %vm548_vm12 = vcmp.ge.f32.partialorder %v488_v58, 0.0  ;;  %v580_v8 = vmul.f32 0.01, %v488_v58  ;;  %vm530_vm13 = vcmp.ge.f32.partialorder %v416_v63, 0.0 }
  0xf3   : > { %952 = vst [vmem:[%s1231_s27] sm:$0xff] %v951_v3   ;;  %v596_v9 = vsel %vm532_vm11, %v424_v57, %v564_v5  ;;  %v562_v10 = vmul.f32 0.01, %v416_v63  ;;  %v578_v11 = vmul.f32 0.01, %v480_v0  ;;  %v427_v12 = vadd.f32 %v1072_v60, %v1216_v22 }
  0xf4   : > { %1035 = vst [vmem:[%s1231_s27 + $0x40] sm:$0xff] %v991_v7   ;;  %v491_v13 = vadd.f32 %v1088_v1, %v1216_v22  ;;  %v419_v14 = vadd.f32 %v1216_v22, %v418_v2  ;;  %v612_v15 = vsel %vm548_vm12, %v488_v58, %v580_v8  ;;  %vm546_vm14 = vcmp.ge.f32.partialorder %v480_v0, 0.0 }
  0xf5   : > { %v594_v16 = vsel %vm530_vm13, %v416_v63, %v562_v10  ;;  %v483_v17 = vadd.f32 %v1216_v22, %v482_v6  ;;  %v1075_v18 = vpop.f32.mrb[8].mxu0  ;;  %vm533_vm15 = vcmp.ge.f32.partialorder %v427_v12, 0.0  ;;  %v565_v19 = vmul.f32 0.01, %v427_v12 }
  0xf6   : > { %vm549_vm0 = vcmp.ge.f32.partialorder %v491_v13, 0.0  ;;  %v581_v20 = vmul.f32 0.01, %v491_v13  ;;  %vm531_vm1 = vcmp.ge.f32.partialorder %v419_v14, 0.0  ;;  %v563_v21 = vmul.f32 0.01, %v419_v14 }
  0xf7   : > { %vm547_vm2 = vcmp.ge.f32.partialorder %v483_v17, 0.0  ;;  %v579_v23 = vmul.f32 0.01, %v483_v17  ;;  %v610_v24 = vsel %vm546_vm14, %v480_v0, %v578_v11  ;;  %v597_v25 = vsel %vm533_vm15, %v427_v12, %v565_v19  ;;  %v1091_v28 = vpop.f32.mrb[8].mxu1  ;;  %v431_v29 = vpop.f32.mrb[9].mxu0 }
  0xf8   : > { %v613_v26 = vsel %vm549_vm0, %v491_v13, %v581_v20  ;;  %v440_v27 = vadd.f32 %v1075_v18, %v1216_v22  ;;  %v966_v30 = vpack.c.bf16 %v597_v25, %v596_v9  ;;  %v595_v32 = vsel %vm531_vm1, %v419_v14, %v563_v21  ;;  %v495_v34 = vpop.f32.mrb[9].mxu1  ;;  %v1076_v35 = vpop.f32.mrb[10].mxu0 }
  0xf9   : > { %v1006_v31 = vpack.c.bf16 %v613_v26, %v612_v15  ;;  %v611_v33 = vsel %vm547_vm2, %v483_v17, %v579_v23  ;;  %v961_v36 = vpack.c.bf16 %v595_v32, %v594_v16  ;;  %v1092_v39 = vpop.f32.mrb[10].mxu1  ;;  %v434_v40 = vpop.f32.mrb[11].mxu0  ;;  %v504_v41 = vadd.f32 %v1091_v28, %v1216_v22 }
  0xfa   : > { %v1001_v37 = vpack.c.bf16 %v611_v33, %v610_v24  ;;  %vm536_vm3 = vcmp.ge.f32.partialorder %v440_v27, 0.0  ;;  %v568_v38 = vmul.f32 0.01, %v440_v27  ;;  %1030 = vst [vmem:[%s1231_s27 + $0x18] sm:$0xff] %v966_v30   ;;  %v432_v42 = vadd.f32 %v1216_v22, %v431_v29  ;;  %v498_v45 = vpop.f32.mrb[11].mxu1 }
  0xfb   : > { %1038 = vst [vmem:[%s1231_s27 + $0x58] sm:$0xff] %v1006_v31   ;;  %v496_v43 = vadd.f32 %v1216_v22, %v495_v34  ;;  %v443_v44 = vadd.f32 %v1076_v35, %v1216_v22  ;;  %1029 = vst [vmem:[%s1231_s27 + $0x10] sm:$0xff] %v961_v36   ;;  %v507_v47 = vadd.f32 %v1092_v39, %v1216_v22  ;;  %vm552_vm4 = vcmp.ge.f32.partialorder %v504_v41, 0.0 }
  0xfc   : > { %1037 = vst [vmem:[%s1231_s27 + $0x50] sm:$0xff] %v1001_v37   ;;  %v600_v46 = vsel %vm536_vm3, %v440_v27, %v568_v38  ;;  %v435_v48 = vadd.f32 %v1216_v22, %v434_v40  ;;  %v499_v49 = vadd.f32 %v1216_v22, %v498_v45  ;;  %v584_v50 = vmul.f32 0.01, %v504_v41 }
  0xfd   : > { %vm534_vm5 = vcmp.ge.f32.partialorder %v432_v42, 0.0  ;;  %v566_v51 = vmul.f32 0.01, %v432_v42  ;;  %vm550_vm6 = vcmp.ge.f32.partialorder %v496_v43, 0.0  ;;  %v582_v52 = vmul.f32 0.01, %v496_v43 }
  0xfe   : > { %vm537_vm7 = vcmp.ge.f32.partialorder %v443_v44, 0.0  ;;  %v569_v53 = vmul.f32 0.01, %v443_v44  ;;  %v616_v54 = vsel %vm552_vm4, %v504_v41, %v584_v50  ;;  %vm553_vm8 = vcmp.ge.f32.partialorder %v507_v47, 0.0  ;;  %v1079_v57 = vpop.f32.mrb[12].mxu0  ;;  %v1095_v58 = vpop.f32.mrb[12].mxu1 }
  0xff   : > { %v598_v55 = vsel %vm534_vm5, %v432_v42, %v566_v51  ;;  %v585_v56 = vmul.f32 0.01, %v507_v47  ;;  %v614_v59 = vsel %vm550_vm6, %v496_v43, %v582_v52  ;;  %vm535_vm9 = vcmp.ge.f32.partialorder %v435_v48, 0.0  ;;  %v447_v62 = vpop.f32.mrb[13].mxu0  ;;  %v511_v63 = vpop.f32.mrb[13].mxu1 }
 0x100   : > { %v601_v60 = vsel %vm537_vm7, %v443_v44, %v569_v53  ;;  %v567_v61 = vmul.f32 0.01, %v435_v48  ;;  %vm551_vm10 = vcmp.ge.f32.partialorder %v499_v49, 0.0  ;;  %v583_v2 = vmul.f32 0.01, %v499_v49  ;;  %v1080_v3 = vpop.f32.mrb[14].mxu0 }
 0x101   : > { %v976_v0 = vpack.c.bf16 %v601_v60, %v600_v46  ;;  %v617_v1 = vsel %vm553_vm8, %v507_v47, %v585_v56  ;;  %v1096_v4 = vpop.f32.mrb[14].mxu1  ;;  %v456_v7 = vadd.f32 %v1079_v57, %v1216_v22  ;;  %v520_v8 = vadd.f32 %v1095_v58, %v1216_v22  ;;  %v450_v9 = vpop.f32.mrb[15].mxu0 }
 0x102   : > { %v1016_v5 = vpack.c.bf16 %v617_v1, %v616_v54  ;;  %v599_v6 = vsel %vm535_vm9, %v435_v48, %v567_v61  ;;  %v514_v10 = vpop.f32.mrb[15].mxu1  ;;  %v615_v12 = vsel %vm551_vm10, %v499_v49, %v583_v2  ;;  %v448_v13 = vadd.f32 %v1216_v22, %v447_v62 }
 0x103   : > { %1032 = vst [vmem:[%s1231_s27 + $0x28] sm:$0xff] %v976_v0   ;;  %v971_v11 = vpack.c.bf16 %v599_v6, %v598_v55  ;;  %v512_v14 = vadd.f32 %v1216_v22, %v511_v63  ;;  %v1011_v15 = vpack.c.bf16 %v615_v12, %v614_v59  ;;  %vm540_vm11 = vcmp.ge.f32.partialorder %v456_v7, 0.0 }
 0x104   : > { %1040 = vst [vmem:[%s1231_s27 + $0x68] sm:$0xff] %v1016_v5   ;;  %v572_v16 = vmul.f32 0.01, %v456_v7  ;;  %vm556_vm12 = vcmp.ge.f32.partialorder %v520_v8, 0.0  ;;  %v588_v17 = vmul.f32 0.01, %v520_v8  ;;  %v459_v18 = vadd.f32 %v1080_v3, %v1216_v22 }
 0x105   : > { %1031 = vst [vmem:[%s1231_s27 + $0x20] sm:$0xff] %v971_v11   ;;  %1039 = vst [vmem:[%s1231_s27 + $0x60] sm:$0xff] %v1011_v15   ;;  %vm538_vm13 = vcmp.ge.f32.partialorder %v448_v13, 0.0  ;;  %v523_v19 = vadd.f32 %v1096_v4, %v1216_v22  ;;  %v570_v20 = vmul.f32 0.01, %v448_v13  ;;  %vm554_vm14 = vcmp.ge.f32.partialorder %v512_v14, 0.0 }
 0x106   : > { %v451_v21 = vadd.f32 %v1216_v22, %v450_v9  ;;  %v515_v23 = vadd.f32 %v1216_v22, %v514_v10  ;;  %v586_v24 = vmul.f32 0.01, %v512_v14  ;;  %vm541_vm15 = vcmp.ge.f32.partialorder %v459_v18, 0.0 }
 0x107   : > { %v573_v25 = vmul.f32 0.01, %v459_v18  ;;  %vm557_vm0 = vcmp.ge.f32.partialorder %v523_v19, 0.0  ;;  %v589_v26 = vmul.f32 0.01, %v523_v19  ;;  %v604_v28 = vsel %vm540_vm11, %v456_v7, %v572_v16 }
 0x108   : > { %vm539_vm1 = vcmp.ge.f32.partialorder %v451_v21, 0.0  ;;  %v571_v27 = vmul.f32 0.01, %v451_v21  ;;  %vm555_vm2 = vcmp.ge.f32.partialorder %v515_v23, 0.0  ;;  %v620_v29 = vsel %vm556_vm12, %v520_v8, %v588_v17 }
 0x109   : > { %v605_v30 = vsel %vm541_vm15, %v459_v18, %v573_v25  ;;  %v587_v31 = vmul.f32 0.01, %v515_v23  ;;  %v602_v22 = vsel %vm538_vm13, %v448_v13, %v570_v20  ;;  %v621_v33 = vsel %vm557_vm0, %v523_v19, %v589_v26 }
 0x10a   : > { %v986_v32 = vpack.c.bf16 %v605_v30, %v604_v28  ;;  %v603_v34 = vsel %vm539_vm1, %v451_v21, %v571_v27  ;;  %v618_v35 = vsel %vm554_vm14, %v512_v14, %v586_v24  ;;  %v1026_v36 = vpack.c.bf16 %v621_v33, %v620_v29 }
 0x10b   : > { %v981_v37 = vpack.c.bf16 %v603_v34, %v602_v22  ;;  %v619_v38 = vsel %vm555_vm2, %v515_v23, %v587_v31 }
 0x10c   : > { %1034 = vst [vmem:[%s1231_s27 + $0x38] sm:$0xff] %v986_v32   ;;  %v1021_v39 = vpack.c.bf16 %v619_v38, %v618_v35  ;;  %1042 = vst [vmem:[%s1231_s27 + $0x78] sm:$0xff] %v1026_v36  }
 0x10d   : > { %1033 = vst [vmem:[%s1231_s27 + $0x30] sm:$0xff] %v981_v37  }
 0x10e   : > { %1041 = vst [vmem:[%s1231_s27 + $0x70] sm:$0xff] %v1021_v39  }
 0x10f PF: > { %s13_s12 = sadd.s32 1, %s1134_s12  }
 0x110   : > { %p10_p4 = scmp.ge.s32.totalorder %s13_s12, 4  }
 0x112   :  { %12 = sbr.rel (!%p10_p4) target bundleno = 1 (0x1), region = 62 }

// kernel: discriminator_wgan_forward.5
= control target key start
LH: loop header
LB: loop body
LE: loop exit
PB: predicated region body
PF: predicated region fallthrough
CT: control target
= control target key end

     0   :  { %s1962_s12 = smov 0   ;;  %s2248_s0 = inlined_call_operand.vmem [shape: bf16[128,1152], index: 0, kind: input, shape index: {}]   ;;  %s2249_s1 = inlined_call_operand.vmem [shape: bf16[1152,128], index: 1, kind: input, shape index: {}]   ;;  %s2250_s2 = inlined_call_operand.vmem [shape: f32[1,128], index: 2, kind: input, shape index: {}]   ;;  %s2251_s3 = inlined_call_operand.vmem [shape: bf16[128,128], index: 3, kind: output, shape index: {}]  }
   0x1 LB: > { %s1430_s13 = sadd.s32 4294967295, %s1940_s12   ;;  %p1434_p0 = scmp.ge.s32.totalorder %s1940_s12, 1  ;;  %s1940_s12 = sphi %s1962_s12, %s13_s12  }
   0x2   : > { %p139_p1 = scmp.lt.s32.totalorder %s1940_s12, 3 }
   0x4   : > { %p140_p2 = pnand %p1434_p0, %p139_p1 }
   0x5   : > { %v1810_v0 = vld [vmem:[%s2249_s1 + $0x40] sm:$0xff] (!%p140_p2)   ;;  %v1814_v4 = vld [vmem:[%s2249_s1 + $0x48] sm:$0xff] (!%p140_p2)   ;;  %v1818_v8 = vld [vmem:[%s2249_s1 + $0x50] sm:$0xff] (!%p140_p2)   ;;  %s1435_s19 = sshll.u32 (!%p140_p2), %s1430_s13, 3 }
   0x6   : > { %143 = sbr.rel (%p140_p2) target bundleno = 330 (0x14a), region = 32  ;;  %v1811_v1 = vld [vmem:[%s2249_s1 + $0xc0] sm:$0xff] (!%p140_p2)   ;;  %1589 = vmatprep.subr.bf16.mxu0 (!%p140_p2), %v1810_v0  ;;  %v1815_v5 = vld [vmem:[%s2249_s1 + $0xc8] sm:$0xff] (!%p140_p2)   ;;  %v1819_v9 = vld [vmem:[%s2249_s1 + $0xd0] sm:$0xff] (!%p140_p2)   ;;  %p165_p3 = scmp.lt.s32.totalorder (!%p140_p2), %s1435_s19, 15 }
   0x7   : > { %v1812_v2 = vld [vmem:[%s2249_s1] sm:$0xff] (!%p140_p2)   ;;  %1629 = vmatprep.subr.bf16.mxu1 (!%p140_p2), %v1811_v1  ;;  %v1816_v6 = vld [vmem:[%s2249_s1 + $0x8] sm:$0xff] (!%p140_p2)   ;;  %v1820_v10 = vld [vmem:[%s2249_s1 + $0x10] sm:$0xff] (!%p140_p2)  }
   0x8   : > { %v1813_v3 = vld [vmem:[%s2249_s1 + $0x80] sm:$0xff] (!%p140_p2)   ;;  %1590 = vmatpush3.bf16.msra.mxu0 (!%p140_p2), %v1812_v2  ;;  %v1817_v7 = vld [vmem:[%s2249_s1 + $0x88] sm:$0xff] (!%p140_p2)   ;;  %v1821_v11 = vld [vmem:[%s2249_s1 + $0x90] sm:$0xff] (!%p140_p2)  }
   0x9   : > { %1630 = vmatpush3.bf16.msra.mxu1 (!%p140_p2), %v1813_v3  ;;  %1591 = vmatprep.subr.bf16.mxu0 (!%p140_p2), %v1814_v4  ;;  %v1822_v12 = vld [vmem:[%s2249_s1 + $0x58] sm:$0xff] (!%p140_p2)   ;;  %v1826_v16 = vld [vmem:[%s2249_s1 + $0x60] sm:$0xff] (!%p140_p2)   ;;  %v1830_v20 = vld [vmem:[%s2249_s1 + $0x68] sm:$0xff] (!%p140_p2)  }
   0xa   : > { %1631 = vmatprep.subr.bf16.mxu1 (!%p140_p2), %v1815_v5  ;;  %v1823_v13 = vld [vmem:[%s2249_s1 + $0xd8] sm:$0xff] (!%p140_p2)   ;;  %v1827_v17 = vld [vmem:[%s2249_s1 + $0xe0] sm:$0xff] (!%p140_p2)   ;;  %v1831_v21 = vld [vmem:[%s2249_s1 + $0xe8] sm:$0xff] (!%p140_p2)  }
   0xb   : > { %v1824_v14 = vld [vmem:[%s2249_s1 + $0x18] sm:$0xff] (!%p140_p2)   ;;  %v1828_v18 = vld [vmem:[%s2249_s1 + $0x20] sm:$0xff] (!%p140_p2)   ;;  %v1832_v22 = vld [vmem:[%s2249_s1 + $0x28] sm:$0xff] (!%p140_p2)  }
   0xc   : > { %1592 = vmatpush3.bf16.msra.mxu0 (!%p140_p2), %v1816_v6  ;;  %v1825_v15 = vld [vmem:[%s2249_s1 + $0x98] sm:$0xff] (!%p140_p2)   ;;  %v1829_v19 = vld [vmem:[%s2249_s1 + $0xa0] sm:$0xff] (!%p140_p2)   ;;  %v1833_v23 = vld [vmem:[%s2249_s1 + $0xa8] sm:$0xff] (!%p140_p2)  }
   0xd   : > { %1632 = vmatpush3.bf16.msra.mxu1 %v1817_v7  ;;  %1593 = vmatprep.subr.bf16.mxu0 %v1818_v8  ;;  %s2253_s19 = smov (!%p165_p3, %s1435_s19), 15  ;;  %v1834_v24 = vld [vmem:[%s2249_s1 + $0x70] sm:$0xff]   ;;  %v1838_v28 = vld [vmem:[%s2249_s1 + $0x78] sm:$0xff]   ;;  %v1848_v36 = vld [vmem:[%s2249_s1 + $0x140] sm:$0xff]  }
   0xe   : > { %1633 = vmatprep.subr.bf16.mxu1 %v1819_v9  ;;  %v1835_v25 = vld [vmem:[%s2249_s1 + $0xf0] sm:$0xff]   ;;  %s1801_s16 = smul.u32 36, %s2253_s19  ;;  %v1839_v29 = vld [vmem:[%s2249_s1 + $0xf8] sm:$0xff]   ;;  %v1849_v37 = vld [vmem:[%s2249_s1 + $0x1c0] sm:$0xff]  }
   0xf   : > { %v1836_v26 = vld [vmem:[%s2249_s1 + $0x30] sm:$0xff]   ;;  %v1840_v30 = vld [vmem:[%s2249_s1 + $0x38] sm:$0xff]   ;;  %v1850_v38 = vld [vmem:[%s2249_s1 + $0x100] sm:$0xff]  }
  0x10   : > { %1594 = vmatpush3.bf16.msra.mxu0 %v1820_v10  ;;  %v1837_v27 = vld [vmem:[%s2249_s1 + $0xb0] sm:$0xff]   ;;  %s2068_s13 = scalar_lea.vmem %s2248_s0, %s1801_s16  ;;  %v1841_v31 = vld [vmem:[%s2249_s1 + $0xb8] sm:$0xff]   ;;  %v1851_v39 = vld [vmem:[%s2249_s1 + $0x180] sm:$0xff]  }
  0x11   : > { %1634 = vmatpush3.bf16.msra.mxu1 %v1821_v11  ;;  %1595 = vmatprep.subr.bf16.mxu0 %v1822_v12  ;;  %v1842_v32 = vld [vmem:[%s2068_s13] ss:$36 sps:$4 sm:$0xff]   ;;  %v1845_v34 = vld [vmem:[%s2068_s13 + $0x8] ss:$36 sps:$4 sm:$0xff]   ;;  %v1858_v45 = vld [vmem:[%s2068_s13 + $0x54] ss:$36 sps:$4 sm:$0xff]  }
  0x12   : > { %1635 = vmatprep.subr.bf16.mxu1 %v1823_v13  ;;  %v1844_v33 = vld [vmem:[%s2068_s13 + $0x4] ss:$36 sps:$4 sm:$0xff]   ;;  %v1847_v35 = vld [vmem:[%s2068_s13 + $0xc] ss:$36 sps:$4 sm:$0xff]   ;;  %v1866_v52 = vld [vmem:[%s2249_s1 + $0x158] sm:$0xff]  }
  0x13   : > { %1017 = vmatprep.mubr.bf16.mxu0 %v1844_v33  ;;  %1082 = vmatprep.mubr.bf16.mxu1 %v1847_v35  ;;  %v1852_v40 = vld [vmem:[%s2249_s1 + $0x148] sm:$0xff]   ;;  %v1861_v47 = vld [vmem:[%s2068_s13 + $0x50] ss:$36 sps:$4 sm:$0xff]   ;;  %v1867_v53 = vld [vmem:[%s2249_s1 + $0x1d8] sm:$0xff]  }
  0x14   : > { %1596 = vmatpush3.bf16.msra.mxu0 %v1824_v14  ;;  %v1853_v41 = vld [vmem:[%s2249_s1 + $0x1c8] sm:$0xff]   ;;  %v1862_v48 = vld [vmem:[%s2249_s1 + $0x150] sm:$0xff]   ;;  %v1868_v54 = vld [vmem:[%s2249_s1 + $0x118] sm:$0xff]  }
  0x15   : > { %1636 = vmatpush3.bf16.msra.mxu1 %v1825_v15  ;;  %1597 = vmatprep.subr.bf16.mxu0 %v1826_v16  ;;  %v1854_v42 = vld [vmem:[%s2249_s1 + $0x108] sm:$0xff]   ;;  %v1863_v49 = vld [vmem:[%s2249_s1 + $0x1d0] sm:$0xff]   ;;  %v1869_v55 = vld [vmem:[%s2249_s1 + $0x198] sm:$0xff]  }
  0x16   : > { %1637 = vmatprep.subr.bf16.mxu1 %v1827_v17  ;;  %v1855_v43 = vld [vmem:[%s2249_s1 + $0x188] sm:$0xff]   ;;  %v1864_v50 = vld [vmem:[%s2249_s1 + $0x110] sm:$0xff]   ;;  %v1872_v57 = vld [vmem:[%s2068_s13 + $0x9c] ss:$36 sps:$4 sm:$0xff]  }
  0x17   : > { %v1856_v44 = vld [vmem:[%s2068_s13 + $0x4c] ss:$36 sps:$4 sm:$0xff]   ;;  %v1870_v56 = vld [vmem:[%s2068_s13 + $0x94] ss:$36 sps:$4 sm:$0xff]   ;;  %v1876_v60 = vld [vmem:[%s2249_s1 + $0x160] sm:$0xff]  }
  0x18   : > { %1598 = vmatpush3.bf16.msra.mxu0 %v1828_v18  ;;  %v1860_v46 = vld [vmem:[%s2068_s13 + $0x48] ss:$36 sps:$4 sm:$0xff]   ;;  %v1865_v51 = vld [vmem:[%s2249_s1 + $0x190] sm:$0xff]   ;;  %v1875_v59 = vld [vmem:[%s2068_s13 + $0x98] ss:$36 sps:$4 sm:$0xff]  }
  0x19   : > { %1638 = vmatpush3.bf16.msra.mxu1 %v1829_v19  ;;  %1599 = vmatprep.subr.bf16.mxu0 %v1830_v20  ;;  %v1874_v58 = vld [vmem:[%s2068_s13 + $0x90] ss:$36 sps:$4 sm:$0xff]   ;;  %v1877_v61 = vld [vmem:[%s2249_s1 + $0x1e0] sm:$0xff]   ;;  %v1880_v0 = vld [vmem:[%s2249_s1 + $0x168] sm:$0xff]  }
  0x1a   : > { %1639 = vmatprep.subr.bf16.mxu1 %v1831_v21  ;;  %v1878_v62 = vld [vmem:[%s2249_s1 + $0x120] sm:$0xff]   ;;  %v1881_v1 = vld [vmem:[%s2249_s1 + $0x1e8] sm:$0xff]   ;;  %v1888_v6 = vld [vmem:[%s2068_s13 + $0xd8] ss:$36 sps:$4 sm:$0xff]  }
  0x1b   : > { %v1879_v63 = vld [vmem:[%s2249_s1 + $0x1a0] sm:$0xff]   ;;  %v1882_v2 = vld [vmem:[%s2249_s1 + $0x128] sm:$0xff]   ;;  %v1890_v8 = vld [vmem:[%s2249_s1 + $0x170] sm:$0xff]  }
  0x1c   : > { %1600 = vmatpush3.bf16.msra.mxu0 %v1832_v22  ;;  %v1883_v3 = vld [vmem:[%s2249_s1 + $0x1a8] sm:$0xff]   ;;  %v1884_v4 = vld [vmem:[%s2068_s13 + $0xdc] ss:$36 sps:$4 sm:$0xff]   ;;  %v1891_v9 = vld [vmem:[%s2249_s1 + $0x1f0] sm:$0xff]  }
  0x1d   : > { %1640 = vmatpush3.bf16.msra.mxu1 %v1833_v23  ;;  %1601 = vmatprep.subr.bf16.mxu0 %v1834_v24  ;;  %v1886_v5 = vld [vmem:[%s2068_s13 + $0xe4] ss:$36 sps:$4 sm:$0xff]   ;;  %v1892_v10 = vld [vmem:[%s2249_s1 + $0x130] sm:$0xff]   ;;  %v1894_v12 = vld [vmem:[%s2249_s1 + $0x178] sm:$0xff]  }
  0x1e   : > { %1641 = vmatprep.subr.bf16.mxu1 %v1835_v25  ;;  %v1889_v7 = vld [vmem:[%s2068_s13 + $0xe0] ss:$36 sps:$4 sm:$0xff]   ;;  %v1893_v11 = vld [vmem:[%s2249_s1 + $0x1b0] sm:$0xff]   ;;  %v1895_v13 = vld [vmem:[%s2249_s1 + $0x1f8] sm:$0xff]  }
  0x1f   : > { %v1896_v14 = vld [vmem:[%s2249_s1 + $0x138] sm:$0xff]   ;;  %v1898_v16 = vld [vmem:[%s2068_s13 + $0x10] ss:$36 sps:$4 sm:$0xff]   ;;  %v1904_v20 = vld [vmem:[%s2249_s1 + $0x200] sm:$0xff]  }
  0x20   : > { %1602 = vmatpush3.bf16.msra.mxu0 %v1836_v26  ;;  %v1897_v15 = vld [vmem:[%s2249_s1 + $0x1b8] sm:$0xff]   ;;  %v1905_v21 = vld [vmem:[%s2249_s1 + $0x208] sm:$0xff]   ;;  %v1911_v25 = vld [vmem:[%s2068_s13 + $0x60] ss:$36 sps:$4 sm:$0xff]  }
  0x21   : > { %1642 = vmatpush3.bf16.msra.mxu1 %v1837_v27  ;;  %1603 = vmatprep.subr.bf16.mxu0 %v1838_v28  ;;  %v1900_v17 = vld [vmem:[%s2068_s13 + $0x14] ss:$36 sps:$4 sm:$0xff]   ;;  %v1903_v19 = vld [vmem:[%s2068_s13 + $0x1c] ss:$36 sps:$4 sm:$0xff]   ;;  %v1908_v23 = vld [vmem:[%s2068_s13 + $0x64] ss:$36 sps:$4 sm:$0xff]  }
  0x22   : > { %1643 = vmatprep.subr.bf16.mxu1 %v1839_v29  ;;  %v1901_v18 = vld [vmem:[%s2068_s13 + $0x18] ss:$36 sps:$4 sm:$0xff]   ;;  %v1912_v26 = vld [vmem:[%s2249_s1 + $0x210] sm:$0xff]   ;;  %v1914_v27 = vld [vmem:[%s2068_s13 + $0xa4] ss:$36 sps:$4 sm:$0xff]  }
  0x23   : > { %v1906_v22 = vld [vmem:[%s2068_s13 + $0x5c] ss:$36 sps:$4 sm:$0xff]   ;;  %v1916_v28 = vld [vmem:[%s2068_s13 + $0xac] ss:$36 sps:$4 sm:$0xff]  }
  0x24   : > { %1604 = vmatpush3.bf16.msra.mxu0 %v1840_v30  ;;  %v1910_v24 = vld [vmem:[%s2068_s13 + $0x58] ss:$36 sps:$4 sm:$0xff]   ;;  %v1918_v30 = vld [vmem:[%s2068_s13 + $0xa0] ss:$36 sps:$4 sm:$0xff]   ;;  %v1922_v33 = vld [vmem:[%s2068_s13 + $0xec] ss:$36 sps:$4 sm:$0xff]  }
  0x25   : > { %1644 = vmatpush3.bf16.msra.mxu1 %v1841_v31  ;;  %1669 = vmatprep.subr.bf16.mxu0 %v1848_v36  ;;  %v1913_v29 = vld [vmem:[%s2249_s1 + $0x218] sm:$0xff]   ;;  %v1919_v31 = vld [vmem:[%s2068_s13 + $0xa8] ss:$36 sps:$4 sm:$0xff]  }
  0x26   : > { %1709 = vmatprep.subr.bf16.mxu1 %v1849_v37  ;;  %v1921_v35 = vld [vmem:[%s2249_s1 + $0x228] sm:$0xff]   ;;  %v1928_v37 = vld [vmem:[%s2249_s1 + $0x230] sm:$0xff]  }
  0x27   : > { %1018 = vmatmul.mubr.bf16.vlgmr.msra.gmra.mrb[0].mxu0 %v1842_v32  ;;  %v1920_v32 = vld [vmem:[%s2249_s1 + $0x220] sm:$0xff]   ;;  %v1926_v36 = vld [vmem:[%s2068_s13 + $0xe8] ss:$36 sps:$4 sm:$0xff]  }
  0x28   : > { %1083 = vmatmul.mubr.bf16.vlgmr.msra.gmra.mrb[0].mxu1 %v1845_v34  ;;  %1670 = vmatpush3.bf16.msra.mxu0 %v1850_v38  ;;  %v1924_v34 = vld [vmem:[%s2068_s13 + $0xf4] ss:$36 sps:$4 sm:$0xff]  }
  0x29   : > { %1710 = vmatpush3.bf16.msra.mxu1 %v1851_v39  ;;  %1671 = vmatprep.subr.bf16.mxu0 %v1852_v40  ;;  %v1927_v38 = vld [vmem:[%s2068_s13 + $0xf0] ss:$36 sps:$4 sm:$0xff]   ;;  %v1930_v39 = vld [vmem:[%s2068_s13 + $0x20] ss:$36 sps:$4 sm:$0xff]  }
  0x2a   : > { %1711 = vmatprep.subr.bf16.mxu1 %v1853_v41  ;;  %1025 = vmatprep.mubr.bf16.mxu0 %v1856_v44  ;;  %v1931_v40 = vld [vmem:[%s2068_s13 + $0xb0] ss:$36 sps:$4 sm:$0xff]   ;;  %v1929_v41 = vld [vmem:[%s2249_s1 + $0x238] sm:$0xff]  }
  0x2b   : > { %1090 = vmatprep.mubr.bf16.mxu1 %v1858_v45 }
  0x2c   : > { %1672 = vmatpush3.bf16.msra.mxu0 %v1854_v42  ;;  %v1932_v42 = vld [vmem:[%s2068_s13 + $0x68] ss:$36 sps:$4 sm:$0xff]  }
  0x2d   : > { %1712 = vmatpush3.bf16.msra.mxu1 %v1855_v43  ;;  %1673 = vmatprep.subr.bf16.mxu0 %v1862_v48  ;;  %v1933_v43 = vld [vmem:[%s2068_s13 + $0xf8] ss:$36 sps:$4 sm:$0xff]   ;;  %s1438_s13 = sshll.u32 %s2253_s19, 2 }
  0x2e   : > { %1713 = vmatprep.subr.bf16.mxu1 %v1863_v49  ;;  %s175_s20 = scalar_lea.vmem %s2251_s3, %s1438_s13 }
  0x2f   : > { %1026 = vmatmul.mubr.bf16.gmra.mrb[4].mxu0 %v1860_v46  ;;  %v1439_v46 = vld [vmem:[%s2250_s2] ss:$0 sm:$0xff] }
  0x30   : > { %1091 = vmatmul.mubr.bf16.gmra.mrb[4].mxu1 %v1861_v47  ;;  %1674 = vmatpush3.bf16.msra.mxu0 %v1864_v50 }
  0x31   : > { %1714 = vmatpush3.bf16.msra.mxu1 %v1865_v51  ;;  %1675 = vmatprep.subr.bf16.mxu0 %v1866_v52 }
  0x32   : > { %1715 = vmatprep.subr.bf16.mxu1 %v1867_v53  ;;  %1033 = vmatprep.mubr.bf16.mxu0 %v1870_v56 }
  0x33   : > { %1098 = vmatprep.mubr.bf16.mxu1 %v1872_v57 }
  0x34   : > { %1676 = vmatpush3.bf16.msra.mxu0 %v1868_v54 }
  0x35   : > { %1716 = vmatpush3.bf16.msra.mxu1 %v1869_v55  ;;  %1677 = vmatprep.subr.bf16.mxu0 %v1876_v60 }
  0x36   : > { %1717 = vmatprep.subr.bf16.mxu1 %v1877_v61 }
  0x37   : > { %1034 = vmatmul.mubr.bf16.gmra.mrb[8].mxu0 %v1874_v58 }
  0x38   : > { %1099 = vmatmul.mubr.bf16.gmra.mrb[8].mxu1 %v1875_v59  ;;  %1678 = vmatpush3.bf16.msra.mxu0 %v1878_v62 }
  0x39   : > { %1718 = vmatpush3.bf16.msra.mxu1 %v1879_v63  ;;  %1679 = vmatprep.subr.bf16.mxu0 %v1880_v0 }
  0x3a   : > { %1719 = vmatprep.subr.bf16.mxu1 %v1881_v1  ;;  %1041 = vmatprep.mubr.bf16.mxu0 %v1884_v4 }
  0x3b   : > { %1106 = vmatprep.mubr.bf16.mxu1 %v1886_v5 }
  0x3c   : > { %1680 = vmatpush3.bf16.msra.mxu0 %v1882_v2 }
  0x3d   : > { %1720 = vmatpush3.bf16.msra.mxu1 %v1883_v3  ;;  %1681 = vmatprep.subr.bf16.mxu0 %v1890_v8 }
  0x3e   : > { %1721 = vmatprep.subr.bf16.mxu1 %v1891_v9 }
  0x3f   : > { %1042 = vmatmul.mubr.bf16.gmra.mrb[12].mxu0 %v1888_v6 }
  0x40   : > { %1107 = vmatmul.mubr.bf16.gmra.mrb[12].mxu1 %v1889_v7  ;;  %1682 = vmatpush3.bf16.msra.mxu0 %v1892_v10 }
  0x41   : > { %1722 = vmatpush3.bf16.msra.mxu1 %v1893_v11  ;;  %1683 = vmatprep.subr.bf16.mxu0 %v1894_v12 }
  0x42   : > { %1723 = vmatprep.subr.bf16.mxu1 %v1895_v13  ;;  %1147 = vmatprep.mubr.bf16.mxu0 %v1900_v17 }
  0x43   : > { %1212 = vmatprep.mubr.bf16.mxu1 %v1903_v19 }
  0x44   : > { %1684 = vmatpush3.bf16.msra.mxu0 %v1896_v14 }
  0x45   : > { %1724 = vmatpush3.bf16.msra.mxu1 %v1897_v15  ;;  %1761 = vmatprep.subr.bf16.mxu0 %v1904_v20 }
  0x46   : > { %1785 = vmatprep.subr.bf16.mxu1 %v1904_v20 }
  0x47   : > { %1148 = vmatmul.mubr.bf16.vlgmr.msra.gmra.mrb[16].mxu0 %v1898_v16 }
  0x48   : > { %1213 = vmatmul.mubr.bf16.vlgmr.msra.gmra.mrb[16].mxu1 %v1901_v18  ;;  %1762 = vmatpush3.bf16.msra.mxu0 %v1904_v20 }
  0x49   : > { %1793 = vmatpush3.bf16.msra.mxu1 %v1904_v20  ;;  %1763 = vmatprep.subr.bf16.mxu0 %v1905_v21 }
  0x4a   : > { %1786 = vmatprep.subr.bf16.mxu1 %v1905_v21  ;;  %1155 = vmatprep.mubr.bf16.mxu0 %v1906_v22 }
  0x4b   : > { %1220 = vmatprep.mubr.bf16.mxu1 %v1908_v23 }
  0x4c   : > { %1764 = vmatpush3.bf16.msra.mxu0 %v1905_v21 }
  0x4d   : > { %1794 = vmatpush3.bf16.msra.mxu1 %v1905_v21  ;;  %1765 = vmatprep.subr.bf16.mxu0 %v1912_v26 }
  0x4e   : > { %1787 = vmatprep.subr.bf16.mxu1 %v1912_v26 }
  0x4f   : > { %1156 = vmatmul.mubr.bf16.gmra.mrb[20].mxu0 %v1910_v24 }
  0x50   : > { %1221 = vmatmul.mubr.bf16.gmra.mrb[20].mxu1 %v1911_v25  ;;  %1163 = vmatprep.mubr.bf16.mxu0 %v1914_v27 }
  0x51   : > { %1766 = vmatpush3.bf16.msra.mxu0 %v1912_v26  ;;  %1228 = vmatprep.mubr.bf16.mxu1 %v1916_v28 }
  0x52   : > { %1795 = vmatpush3.bf16.msra.mxu1 %v1912_v26  ;;  %1767 = vmatprep.subr.bf16.mxu0 %v1913_v29 }
  0x53   : > { %1788 = vmatprep.subr.bf16.mxu1 %v1913_v29 }
  0x55   : > { %1768 = vmatpush3.bf16.msra.mxu0 %v1913_v29 }
  0x56   : > { %1796 = vmatpush3.bf16.msra.mxu1 %v1913_v29  ;;  %1769 = vmatprep.subr.bf16.mxu0 %v1920_v32 }
  0x57   : > { %1164 = vmatmul.mubr.bf16.gmra.mrb[24].mxu0 %v1918_v30  ;;  %1789 = vmatprep.subr.bf16.mxu1 %v1920_v32 }
  0x58   : > { %1229 = vmatmul.mubr.bf16.gmra.mrb[24].mxu1 %v1919_v31  ;;  %1171 = vmatprep.mubr.bf16.mxu0 %v1922_v33 }
  0x59   : > { %1770 = vmatpush3.bf16.msra.mxu0 %v1920_v32  ;;  %1236 = vmatprep.mubr.bf16.mxu1 %v1924_v34 }
  0x5a   : > { %1797 = vmatpush3.bf16.msra.mxu1 %v1920_v32  ;;  %1771 = vmatprep.subr.bf16.mxu0 %v1921_v35 }
  0x5b   : > { %1790 = vmatprep.subr.bf16.mxu1 %v1921_v35 }
  0x5d   : > { %1772 = vmatpush3.bf16.msra.mxu0 %v1921_v35 }
  0x5e   : > { %1798 = vmatpush3.bf16.msra.mxu1 %v1921_v35  ;;  %1773 = vmatprep.subr.bf16.mxu0 %v1928_v37 }
  0x5f   : > { %1172 = vmatmul.mubr.bf16.gmra.mrb[28].mxu0 %v1926_v36  ;;  %1791 = vmatprep.subr.bf16.mxu1 %v1928_v37 }
  0x60   : > { %1237 = vmatmul.mubr.bf16.gmra.mrb[28].mxu1 %v1927_v38  ;;  %1777 = vmatprep.mubr.bf16.mxu0 %v1930_v39 }
  0x61   : > { %1774 = vmatpush3.bf16.msra.mxu0 %v1928_v37  ;;  %1781 = vmatprep.mubr.bf16.mxu1 %v1931_v40 }
  0x62   : > { %1799 = vmatpush3.bf16.msra.mxu1 %v1928_v37  ;;  %1775 = vmatprep.subr.bf16.mxu0 %v1929_v41 }
  0x63   : > { %1792 = vmatprep.subr.bf16.mxu1 %v1929_v41 }
  0x65   : > { %1776 = vmatpush3.bf16.msra.mxu0 %v1929_v41 }
  0x66   : > { %1800 = vmatpush3.bf16.msra.mxu1 %v1929_v41 }
  0x68   : > { %1778 = vmatmul.mubr.bf16.vlgmr.msra.gmra.mrb[32].mxu0 %v1932_v42 }
  0x69   : > { %1782 = vmatmul.mubr.bf16.vlgmr.msra.gmra.mrb[32].mxu1 %v1933_v43 }
  0xfa   : > { %v1605_v44 = vpop.f32.mrb[0].mxu0 }
  0xfb   : > { %v1645_v45 = vpop.f32.mrb[0].mxu1  ;;  %v1606_v47 = vpop.f32.mrb[1].mxu0 }
  0xfc   : > { %v1607_v48 = vadd.f32 %v1606_v47, %v1605_v44  ;;  %v1646_v49 = vpop.f32.mrb[1].mxu1  ;;  %v1608_v50 = vpop.f32.mrb[2].mxu0 }
  0xfd   : > { %v1647_v51 = vadd.f32 %v1646_v49, %v1645_v45  ;;  %v1648_v52 = vpop.f32.mrb[2].mxu1  ;;  %v1609_v53 = vpop.f32.mrb[3].mxu0 }
  0xfe   : > { %v1020_v54 = vadd.f32 %v1607_v48, %v1439_v46  ;;  %v1610_v55 = vadd.f32 %v1609_v53, %v1608_v50  ;;  %v1649_v56 = vpop.f32.mrb[3].mxu1 }
  0xff   : > { %v1650_v57 = vadd.f32 %v1649_v56, %v1648_v52 }
 0x100   : > { %v1085_v58 = vadd.f32 %v1647_v51, %v1020_v54  ;;  %v1023_v59 = vadd.f32 %v1610_v55, %v1439_v46 }
 0x102   : > { %v1088_v60 = vadd.f32 %v1650_v57, %v1023_v59  ;;  %v1611_v61 = vpop.f32.mrb[4].mxu0 }
 0x103   : > { %v1651_v62 = vpop.f32.mrb[4].mxu1  ;;  %v1612_v63 = vpop.f32.mrb[5].mxu0 }
 0x104   : > { %v1613_v0 = vadd.f32 %v1612_v63, %v1611_v61  ;;  %v1652_v1 = vpop.f32.mrb[5].mxu1  ;;  %v1614_v2 = vpop.f32.mrb[6].mxu0 }
 0x105   : > { %v1653_v3 = vadd.f32 %v1652_v1, %v1651_v62  ;;  %v1654_v4 = vpop.f32.mrb[6].mxu1  ;;  %v1615_v5 = vpop.f32.mrb[7].mxu0 }
 0x106   : > { %v1028_v6 = vadd.f32 %v1613_v0, %v1439_v46  ;;  %v1616_v7 = vadd.f32 %v1615_v5, %v1614_v2  ;;  %v1655_v8 = vpop.f32.mrb[7].mxu1 }
 0x107   : > { %v1656_v9 = vadd.f32 %v1655_v8, %v1654_v4 }
 0x108   : > { %v1093_v10 = vadd.f32 %v1653_v3, %v1028_v6  ;;  %v1031_v11 = vadd.f32 %v1616_v7, %v1439_v46 }
 0x10a   : > { %v1096_v12 = vadd.f32 %v1656_v9, %v1031_v11  ;;  %v1617_v13 = vpop.f32.mrb[8].mxu0 }
 0x10b   : > { %v1657_v14 = vpop.f32.mrb[8].mxu1  ;;  %v1618_v15 = vpop.f32.mrb[9].mxu0 }
 0x10c   : > { %v1619_v16 = vadd.f32 %v1618_v15, %v1617_v13  ;;  %v1658_v17 = vpop.f32.mrb[9].mxu1  ;;  %v1620_v18 = vpop.f32.mrb[10].mxu0 }
 0x10d   : > { %v1659_v19 = vadd.f32 %v1658_v17, %v1657_v14  ;;  %v1660_v20 = vpop.f32.mrb[10].mxu1  ;;  %v1621_v21 = vpop.f32.mrb[11].mxu0 }
 0x10e   : > { %v1036_v22 = vadd.f32 %v1619_v16, %v1439_v46  ;;  %v1622_v23 = vadd.f32 %v1621_v21, %v1620_v18  ;;  %v1661_v24 = vpop.f32.mrb[11].mxu1 }
 0x10f   : > { %v1662_v25 = vadd.f32 %v1661_v24, %v1660_v20 }
 0x110   : > { %v1101_v26 = vadd.f32 %v1659_v19, %v1036_v22  ;;  %v1039_v27 = vadd.f32 %v1622_v23, %v1439_v46 }
 0x112   : > { %v1104_v28 = vadd.f32 %v1662_v25, %v1039_v27  ;;  %v1623_v29 = vpop.f32.mrb[12].mxu0 }
 0x113   : > { %v1663_v30 = vpop.f32.mrb[12].mxu1  ;;  %v1624_v31 = vpop.f32.mrb[13].mxu0 }
 0x114   : > { %v1664_v32 = vpop.f32.mrb[13].mxu1  ;;  %v1625_v33 = vadd.f32 %v1624_v31, %v1623_v29  ;;  %v1626_v35 = vpop.f32.mrb[14].mxu0 }
 0x115   : > { %v1665_v34 = vadd.f32 %v1664_v32, %v1663_v30  ;;  %v1666_v36 = vpop.f32.mrb[14].mxu1  ;;  %v1627_v37 = vpop.f32.mrb[15].mxu0 }
 0x116   : > { %v1667_v38 = vpop.f32.mrb[15].mxu1  ;;  %v1044_v39 = vadd.f32 %v1625_v33, %v1439_v46  ;;  %v1628_v40 = vadd.f32 %v1627_v37, %v1626_v35 }
 0x117   : > { %v1668_v41 = vadd.f32 %v1667_v38, %v1666_v36 }
 0x118   : > { %v1109_v42 = vadd.f32 %v1665_v34, %v1044_v39  ;;  %v1047_v43 = vadd.f32 %v1628_v40, %v1439_v46 }
 0x11a   : > { %v1112_v44 = vadd.f32 %v1668_v41, %v1047_v43  ;;  %v1685_v45 = vpop.f32.mrb[16].mxu0 }
 0x11b   : > { %v1686_v47 = vpop.f32.mrb[17].mxu0  ;;  %v1725_v48 = vpop.f32.mrb[16].mxu1 }
 0x11c   : > { %v1687_v49 = vadd.f32 %v1686_v47, %v1685_v45  ;;  %v1688_v50 = vpop.f32.mrb[18].mxu0  ;;  %v1726_v51 = vpop.f32.mrb[17].mxu1 }
 0x11d   : > { %v1689_v52 = vpop.f32.mrb[19].mxu0  ;;  %v1727_v54 = vadd.f32 %v1726_v51, %v1725_v48  ;;  %v1728_v55 = vpop.f32.mrb[18].mxu1 }
 0x11e   : > { %v1150_v53 = vadd.f32 %v1687_v49, %v1085_v58  ;;  %v1690_v56 = vadd.f32 %v1689_v52, %v1688_v50  ;;  %v1729_v57 = vpop.f32.mrb[19].mxu1 }
 0x11f   : > { %v1730_v61 = vadd.f32 %v1729_v57, %v1728_v55 }
 0x120   : > { %v1153_v59 = vadd.f32 %v1690_v56, %v1088_v60  ;;  %v1215_v62 = vadd.f32 %v1727_v54, %v1150_v53 }
 0x122   : > { %v1691_v63 = vpop.f32.mrb[20].mxu0  ;;  %v2235_v0 = vadd.f32 %v1730_v61, %v1153_v59 }
 0x123   : > { %v1692_v46 = vpop.f32.mrb[21].mxu0  ;;  %v1731_v1 = vpop.f32.mrb[20].mxu1 }
 0x124   : > { %v1693_v2 = vadd.f32 %v1692_v46, %v1691_v63  ;;  %v1694_v3 = vpop.f32.mrb[22].mxu0  ;;  %v1732_v4 = vpop.f32.mrb[21].mxu1 }
 0x125   : > { %v1695_v5 = vpop.f32.mrb[23].mxu0  ;;  %v1733_v7 = vadd.f32 %v1732_v4, %v1731_v1  ;;  %v1734_v8 = vpop.f32.mrb[22].mxu1 }
 0x126   : > { %v1158_v6 = vadd.f32 %v1693_v2, %v1093_v10  ;;  %v1696_v58 = vadd.f32 %v1695_v5, %v1694_v3  ;;  %v1735_v9 = vpop.f32.mrb[23].mxu1 }
 0x127   : > { %v1736_v13 = vadd.f32 %v1735_v9, %v1734_v8 }
 0x128   : > { %v1161_v11 = vadd.f32 %v1696_v58, %v1096_v12  ;;  %v1223_v14 = vadd.f32 %v1733_v7, %v1158_v6 }
 0x12a   : > { %v1697_v60 = vpop.f32.mrb[24].mxu0  ;;  %v1226_v15 = vadd.f32 %v1736_v13, %v1161_v11 }
 0x12b   : > { %v1698_v16 = vpop.f32.mrb[25].mxu0  ;;  %v1737_v17 = vpop.f32.mrb[24].mxu1 }
 0x12c   : > { %v1699_v18 = vadd.f32 %v1698_v16, %v1697_v60  ;;  %v1700_v19 = vpop.f32.mrb[26].mxu0  ;;  %v1738_v20 = vpop.f32.mrb[25].mxu1 }
 0x12d   : > { %v1701_v21 = vpop.f32.mrb[27].mxu0  ;;  %v1739_v23 = vadd.f32 %v1738_v20, %v1737_v17  ;;  %v1740_v24 = vpop.f32.mrb[26].mxu1 }
 0x12e   : > { %v1166_v22 = vadd.f32 %v1699_v18, %v1101_v26  ;;  %v1702_v25 = vadd.f32 %v1701_v21, %v1700_v19  ;;  %v1741_v10 = vpop.f32.mrb[27].mxu1 }
 0x12f   : > { %v1742_v29 = vadd.f32 %v1741_v10, %v1740_v24 }
 0x130   : > { %v1169_v27 = vadd.f32 %v1702_v25, %v1104_v28  ;;  %v1231_v30 = vadd.f32 %v1739_v23, %v1166_v22 }
 0x132   : > { %v1703_v31 = vpop.f32.mrb[28].mxu0  ;;  %v1234_v12 = vadd.f32 %v1742_v29, %v1169_v27 }
 0x133   : > { %v1704_v32 = vpop.f32.mrb[29].mxu0  ;;  %v1743_v33 = vpop.f32.mrb[28].mxu1 }
 0x134   : > { %v1705_v34 = vadd.f32 %v1704_v32, %v1703_v31  ;;  %v1706_v35 = vpop.f32.mrb[30].mxu0  ;;  %v1744_v36 = vpop.f32.mrb[29].mxu1 }
 0x135   : > { %v1707_v37 = vpop.f32.mrb[31].mxu0  ;;  %v1745_v39 = vadd.f32 %v1744_v36, %v1743_v33  ;;  %v1746_v40 = vpop.f32.mrb[30].mxu1 }
 0x136   : > { %v1174_v38 = vadd.f32 %v1705_v34, %v1109_v42  ;;  %v1708_v41 = vadd.f32 %v1707_v37, %v1706_v35  ;;  %v1747_v26 = vpop.f32.mrb[31].mxu1 }
 0x137   : > { %v1748_v45 = vadd.f32 %v1747_v26, %v1746_v40 }
 0x138   : > { %v1177_v43 = vadd.f32 %v1708_v41, %v1112_v44  ;;  %v1239_v47 = vadd.f32 %v1745_v39, %v1174_v38 }
 0x13a   : > { %v1242_v48 = vadd.f32 %v1748_v45, %v1177_v43 }
 0x13b   : > { %v1779_v28 = vpop.f32.mrb[32].mxu0 }
 0x13c   : > { %v1288_v49 = vadd.f32 %v1779_v28, %v1223_v14  ;;  %v1783_v50 = vpop.f32.mrb[32].mxu1  ;;  %v1279_v51 = vpop.f32.mrb[33].mxu0 }
 0x13d   : > { %v1304_v52 = vadd.f32 %v1783_v50, %v1239_v47  ;;  %v1280_v53 = vadd.f32 %v1279_v51, %v1215_v62  ;;  %v1295_v54 = vpop.f32.mrb[33].mxu1  ;;  %v1780_v55 = vpop.f32.mrb[34].mxu0 }
 0x13e   : > { %v1320_v56 = vmul.f32 0.01, %v1288_v49  ;;  %v1296_v57 = vadd.f32 %v1295_v54, %v1231_v30  ;;  %v1291_v42 = vadd.f32 %v1780_v55, %v1226_v15  ;;  %v1784_v59 = vpop.f32.mrb[34].mxu1  ;;  %v1282_v61 = vpop.f32.mrb[35].mxu0  ;;  %vm1312_vm0 = vcmp.ge.f32.partialorder %v1288_v49, 0.0 }
 0x13f   : > { %vm1316_vm1 = vcmp.ge.f32.partialorder %v1304_v52, 0.0  ;;  %v1324_v44 = vmul.f32 0.01, %v1304_v52  ;;  %v1298_v63 = vpop.f32.mrb[35].mxu1  ;;  %vm1310_vm3 = vcmp.ge.f32.partialorder %v1280_v53, 0.0  ;;  %v1307_v2 = vadd.f32 %v1784_v59, %v1242_v48 }
 0x140   : > { %vm1313_vm2 = vcmp.ge.f32.partialorder %v1291_v42, 0.0  ;;  %v1318_v46 = vmul.f32 0.01, %v1280_v53  ;;  %v1321_v1 = vmul.f32 0.01, %v1291_v42  ;;  %v1328_v3 = vsel %vm1312_vm0, %v1288_v49, %v1320_v56 }
 0x141   : > { %vm1314_vm4 = vcmp.ge.f32.partialorder %v1296_v57, 0.0  ;;  %v1283_v62 = vadd.f32 %v1282_v61, %v2235_v0  ;;  %v1299_v4 = vadd.f32 %v1298_v63, %v1234_v12  ;;  %v1322_v5 = vmul.f32 0.01, %v1296_v57 }
 0x142   : > { %v1329_v6 = vsel %vm1313_vm2, %v1291_v42, %v1321_v1  ;;  %vm1317_vm5 = vcmp.ge.f32.partialorder %v1307_v2, 0.0  ;;  %v1325_v7 = vmul.f32 0.01, %v1307_v2  ;;  %v1332_v9 = vsel %vm1316_vm1, %v1304_v52, %v1324_v44 }
 0x143   : > { %v1574_v8 = vpack.c.bf16 %v1329_v6, %v1328_v3  ;;  %vm1311_vm6 = vcmp.ge.f32.partialorder %v1283_v62, 0.0  ;;  %v1319_v58 = vmul.f32 0.01, %v1283_v62  ;;  %vm1315_vm7 = vcmp.ge.f32.partialorder %v1299_v4, 0.0 }
 0x144   : > { %v1333_v11 = vsel %vm1317_vm5, %v1307_v2, %v1325_v7  ;;  %v1323_v13 = vmul.f32 0.01, %v1299_v4  ;;  %v1326_v14 = vsel %vm1310_vm3, %v1280_v53, %v1318_v46  ;;  %v1330_v15 = vsel %vm1314_vm4, %v1296_v57, %v1322_v5 }
 0x145   : > { %1586 = vst [vmem:[%s175_s20 + $0x8] sm:$0xff] %v1574_v8   ;;  %v1584_v0 = vpack.c.bf16 %v1333_v11, %v1332_v9  ;;  %v1327_v60 = vsel %vm1311_vm6, %v1283_v62, %v1319_v58 }
 0x146   : > { %v1569_v16 = vpack.c.bf16 %v1327_v60, %v1326_v14  ;;  %v1331_v17 = vsel %vm1315_vm7, %v1299_v4, %v1323_v13 }
 0x147   : > { %1588 = vst [vmem:[%s175_s20 + $0x18] sm:$0xff] %v1584_v0   ;;  %v1579_v18 = vpack.c.bf16 %v1331_v17, %v1330_v15 }
 0x148   : > { %1570 = vst [vmem:[%s175_s20] sm:$0xff] %v1569_v16  }
 0x149   : > { %1587 = vst [vmem:[%s175_s20 + $0x10] sm:$0xff] %v1579_v18  }
 0x14a PF: > { %s13_s12 = sadd.s32 1, %s1940_s12  }
 0x14b   : > { %p10_p4 = scmp.ge.s32.totalorder %s13_s12, 4  }
 0x14d   :  { %12 = sbr.rel (!%p10_p4) target bundleno = 1 (0x1), region = 62 }

// kernel: discriminator_wgan_forward.6
= control target key start
LH: loop header
LB: loop body
LE: loop exit
PB: predicated region body
PF: predicated region fallthrough
CT: control target
= control target key end

     0   :  { %s1869_s12 = smov 0   ;;  %s2338_s0 = inlined_call_operand.vmem [shape: bf16[32,1152], index: 0, kind: input, shape index: {}]   ;;  %s2339_s1 = inlined_call_operand.vmem [shape: bf16[1152,256], index: 1, kind: input, shape index: {}]   ;;  %s2340_s2 = inlined_call_operand.vmem [shape: f32[1,256], index: 2, kind: input, shape index: {}]   ;;  %s2341_s3 = inlined_call_operand.vmem [shape: bf16[32,256], index: 3, kind: output, shape index: {}]  }
   0x1 LB: > { %s1411_s13 = sadd.s32 4294967295, %s1846_s12   ;;  %p1415_p0 = scmp.ge.s32.totalorder %s1846_s12, 1  ;;  %s1846_s12 = sphi %s1869_s12, %s13_s12  }
   0x2   : > { %p139_p1 = scmp.lt.s32.totalorder %s1846_s12, 3 }
   0x4   : > { %p140_p2 = pnand %p1415_p0, %p139_p1 }
   0x5   : > { %v1611_v0 = vld [vmem:[%s2339_s1 + $0x4] ss:$8 sps:$4 sm:$0xff] (!%p140_p2)   ;;  %v1615_v2 = vld [vmem:[%s2339_s1] ss:$8 sps:$4 sm:$0xff] (!%p140_p2)   ;;  %v1617_v4 = vld [vmem:[%s2339_s1 + $0x14] ss:$8 sps:$4 sm:$0xff] (!%p140_p2)  }
   0x6   : > { %143 = sbr.rel (%p140_p2) target bundleno = 390 (0x186), region = 32  ;;  %v1613_v1 = vld [vmem:[%s2339_s1 + $0x204] ss:$8 sps:$4 sm:$0xff] (!%p140_p2)   ;;  %1112 = vmatprep.subr.bf16.mxu1 (!%p140_p2), %v1611_v0  ;;  %v1616_v3 = vld [vmem:[%s2339_s1 + $0x200] ss:$8 sps:$4 sm:$0xff] (!%p140_p2)   ;;  %s1416_s24 = sshll.u32 (!%p140_p2), %s1411_s13, 1 }
   0x7   : > { %1198 = vmatprep.subr.bf16.mxu0 (!%p140_p2), %v1613_v1  ;;  %1113 = vmatpush1.bf16.msra.mxu1 (!%p140_p2), %v1615_v2  ;;  %v1619_v5 = vld [vmem:[%s2339_s1 + $0x214] ss:$8 sps:$4 sm:$0xff] (!%p140_p2)   ;;  %v1621_v6 = vld [vmem:[%s2339_s1 + $0x10] ss:$8 sps:$4 sm:$0xff] (!%p140_p2)   ;;  %v1623_v8 = vld [vmem:[%s2339_s1 + $0x24] ss:$8 sps:$4 sm:$0xff] (!%p140_p2)  }
   0x8   : > { %1199 = vmatpush1.bf16.msra.mxu0 (!%p140_p2), %v1616_v3  ;;  %1114 = vmatprep.subr.bf16.mxu1 (!%p140_p2), %v1617_v4  ;;  %v1622_v7 = vld [vmem:[%s2339_s1 + $0x210] ss:$8 sps:$4 sm:$0xff] (!%p140_p2)   ;;  %v1625_v9 = vld [vmem:[%s2339_s1 + $0x224] ss:$8 sps:$4 sm:$0xff] (!%p140_p2)   ;;  %v1627_v10 = vld [vmem:[%s2339_s1 + $0x20] ss:$8 sps:$4 sm:$0xff] (!%p140_p2)  }
   0x9   : > { %1200 = vmatprep.subr.bf16.mxu0 (!%p140_p2), %v1619_v5  ;;  %v1628_v11 = vld [vmem:[%s2339_s1 + $0x220] ss:$8 sps:$4 sm:$0xff] (!%p140_p2)   ;;  %v1629_v12 = vld [vmem:[%s2339_s1 + $0x34] ss:$8 sps:$4 sm:$0xff] (!%p140_p2)   ;;  %v1633_v14 = vld [vmem:[%s2339_s1 + $0x30] ss:$8 sps:$4 sm:$0xff] (!%p140_p2)  }
   0xa   : > { %v1631_v13 = vld [vmem:[%s2339_s1 + $0x234] ss:$8 sps:$4 sm:$0xff] (!%p140_p2)   ;;  %v1634_v15 = vld [vmem:[%s2339_s1 + $0x230] ss:$8 sps:$4 sm:$0xff] (!%p140_p2)   ;;  %v1635_v16 = vld [vmem:[%s2339_s1 + $0x44] ss:$8 sps:$4 sm:$0xff] (!%p140_p2)  }
   0xb   : > { %1115 = vmatpush1.bf16.msra.mxu1 (!%p140_p2), %v1621_v6  ;;  %v1637_v17 = vld [vmem:[%s2339_s1 + $0x244] ss:$8 sps:$4 sm:$0xff] (!%p140_p2)   ;;  %v1639_v18 = vld [vmem:[%s2339_s1 + $0x40] ss:$8 sps:$4 sm:$0xff] (!%p140_p2)   ;;  %v1641_v20 = vld [vmem:[%s2339_s1 + $0x54] ss:$8 sps:$4 sm:$0xff] (!%p140_p2)  }
   0xc   : > { %1201 = vmatpush1.bf16.msra.mxu0 (!%p140_p2), %v1622_v7  ;;  %1116 = vmatprep.subr.bf16.mxu1 (!%p140_p2), %v1623_v8  ;;  %v1640_v19 = vld [vmem:[%s2339_s1 + $0x240] ss:$8 sps:$4 sm:$0xff] (!%p140_p2)   ;;  %v1643_v21 = vld [vmem:[%s2339_s1 + $0x254] ss:$8 sps:$4 sm:$0xff] (!%p140_p2)   ;;  %v1645_v22 = vld [vmem:[%s2339_s1 + $0x50] ss:$8 sps:$4 sm:$0xff] (!%p140_p2)  }
   0xd   : > { %1202 = vmatprep.subr.bf16.mxu0 %v1625_v9  ;;  %v1646_v23 = vld [vmem:[%s2339_s1 + $0x250] ss:$8 sps:$4 sm:$0xff]   ;;  %v1647_v24 = vld [vmem:[%s2339_s1 + $0x64] ss:$8 sps:$4 sm:$0xff]   ;;  %v1651_v26 = vld [vmem:[%s2339_s1 + $0x60] ss:$8 sps:$4 sm:$0xff]  }
   0xe   : > { %v1649_v25 = vld [vmem:[%s2339_s1 + $0x264] ss:$8 sps:$4 sm:$0xff]   ;;  %v1652_v27 = vld [vmem:[%s2339_s1 + $0x260] ss:$8 sps:$4 sm:$0xff]   ;;  %v1653_v28 = vld [vmem:[%s2339_s1 + $0x74] ss:$8 sps:$4 sm:$0xff]  }
   0xf   : > { %1117 = vmatpush1.bf16.msra.mxu1 %v1627_v10  ;;  %v1655_v29 = vld [vmem:[%s2339_s1 + $0x274] ss:$8 sps:$4 sm:$0xff]   ;;  %v1657_v30 = vld [vmem:[%s2339_s1 + $0x70] ss:$8 sps:$4 sm:$0xff]   ;;  %v1659_v32 = vld [vmem:[%s2339_s1 + $0x84] ss:$8 sps:$4 sm:$0xff]  }
  0x10   : > { %1203 = vmatpush1.bf16.msra.mxu0 %v1628_v11  ;;  %1118 = vmatprep.subr.bf16.mxu1 %v1629_v12  ;;  %v1658_v31 = vld [vmem:[%s2339_s1 + $0x270] ss:$8 sps:$4 sm:$0xff]   ;;  %p166_p3 = scmp.lt.s32.totalorder %s1416_s24, 3  ;;  %v1661_v33 = vld [vmem:[%s2339_s1 + $0x284] ss:$8 sps:$4 sm:$0xff]  }
  0x11   : > { %1204 = vmatprep.subr.bf16.mxu0 %v1631_v13  ;;  %v1663_v34 = vld [vmem:[%s2339_s1 + $0x80] ss:$8 sps:$4 sm:$0xff]   ;;  %v1665_v36 = vld [vmem:[%s2339_s1 + $0x94] ss:$8 sps:$4 sm:$0xff]   ;;  %v1669_v38 = vld [vmem:[%s2339_s1 + $0x90] ss:$8 sps:$4 sm:$0xff]  }
  0x12   : > { %v1664_v35 = vld [vmem:[%s2339_s1 + $0x280] ss:$8 sps:$4 sm:$0xff]   ;;  %s2343_s24 = smov (!%p166_p3, %s1416_s24), 3  ;;  %v1667_v37 = vld [vmem:[%s2339_s1 + $0x294] ss:$8 sps:$4 sm:$0xff]  }
  0x13   : > { %1119 = vmatpush1.bf16.msra.mxu1 %v1633_v14  ;;  %v1670_v39 = vld [vmem:[%s2339_s1 + $0x290] ss:$8 sps:$4 sm:$0xff]   ;;  %v1671_v40 = vld [vmem:[%s2339_s1 + $0xa4] ss:$8 sps:$4 sm:$0xff]   ;;  %s1601_s21 = smul.u32 36, %s2343_s24 }
  0x14   : > { %1205 = vmatpush1.bf16.msra.mxu0 %v1634_v15  ;;  %1120 = vmatprep.subr.bf16.mxu1 %v1635_v16  ;;  %v1673_v41 = vld [vmem:[%s2339_s1 + $0x2a4] ss:$8 sps:$4 sm:$0xff]   ;;  %v1675_v42 = vld [vmem:[%s2339_s1 + $0xa0] ss:$8 sps:$4 sm:$0xff]   ;;  %v1677_v44 = vld [vmem:[%s2339_s1 + $0xb4] ss:$8 sps:$4 sm:$0xff]  }
  0x15   : > { %1206 = vmatprep.subr.bf16.mxu0 %v1637_v17  ;;  %v1676_v43 = vld [vmem:[%s2339_s1 + $0x2a0] ss:$8 sps:$4 sm:$0xff]   ;;  %s2020_s13 = scalar_lea.vmem %s2338_s0, %s1601_s21  ;;  %v1679_v45 = vld [vmem:[%s2339_s1 + $0x2b4] ss:$8 sps:$4 sm:$0xff]   ;;  %v1681_v46 = vld [vmem:[%s2339_s1 + $0xb0] ss:$8 sps:$4 sm:$0xff]  }
  0x16   : > { %v1682_v47 = vld [vmem:[%s2339_s1 + $0x2b0] ss:$8 sps:$4 sm:$0xff]   ;;  %v1709_v48 = vld [vmem:[%s2020_s13 + $0x4] ss:$36 sps:$4 sm:$0xff]   ;;  %v1689_v54 = vld [vmem:[%s2339_s1 + $0xd4] ss:$8 sps:$4 sm:$0xff]  }
  0x17   : > { %1121 = vmatpush1.bf16.msra.mxu1 %v1639_v18  ;;  %v1683_v49 = vld [vmem:[%s2339_s1 + $0xc4] ss:$8 sps:$4 sm:$0xff]   ;;  %1144 = vmatprep.mubr.bf16.mxu1 %v1709_v48  ;;  %v1715_v51 = vld [vmem:[%s2020_s13 + $0x14] ss:$36 sps:$4 sm:$0xff]   ;;  %v1687_v52 = vld [vmem:[%s2339_s1 + $0xc0] ss:$8 sps:$4 sm:$0xff]  }
  0x18   : > { %1207 = vmatpush1.bf16.msra.mxu0 %v1640_v19  ;;  %1122 = vmatprep.subr.bf16.mxu1 %v1641_v20  ;;  %v1685_v50 = vld [vmem:[%s2339_s1 + $0x2c4] ss:$8 sps:$4 sm:$0xff]   ;;  %v1688_v53 = vld [vmem:[%s2339_s1 + $0x2c0] ss:$8 sps:$4 sm:$0xff]   ;;  %v1691_v55 = vld [vmem:[%s2339_s1 + $0x2d4] ss:$8 sps:$4 sm:$0xff]  }
  0x19   : > { %1208 = vmatprep.subr.bf16.mxu0 %v1643_v21  ;;  %1230 = vmatprep.mubr.bf16.mxu0 %v1715_v51  ;;  %v1693_v56 = vld [vmem:[%s2339_s1 + $0xd0] ss:$8 sps:$4 sm:$0xff]   ;;  %v1695_v58 = vld [vmem:[%s2339_s1 + $0xe4] ss:$8 sps:$4 sm:$0xff]   ;;  %v1699_v60 = vld [vmem:[%s2339_s1 + $0xe0] ss:$8 sps:$4 sm:$0xff]  }
  0x1a   : > { %v1694_v57 = vld [vmem:[%s2339_s1 + $0x2d0] ss:$8 sps:$4 sm:$0xff]   ;;  %v1697_v59 = vld [vmem:[%s2339_s1 + $0x2e4] ss:$8 sps:$4 sm:$0xff]   ;;  %v1700_v61 = vld [vmem:[%s2339_s1 + $0x2e0] ss:$8 sps:$4 sm:$0xff]  }
  0x1b   : > { %1123 = vmatpush1.bf16.msra.mxu1 %v1645_v22  ;;  %v1701_v62 = vld [vmem:[%s2339_s1 + $0xf4] ss:$8 sps:$4 sm:$0xff]   ;;  %v1705_v0 = vld [vmem:[%s2339_s1 + $0xf0] ss:$8 sps:$4 sm:$0xff]   ;;  %v1712_v2 = vld [vmem:[%s2339_s1 + $0x104] ss:$8 sps:$4 sm:$0xff]  }
  0x1c   : > { %1209 = vmatpush1.bf16.msra.mxu0 %v1646_v23  ;;  %1124 = vmatprep.subr.bf16.mxu1 %v1647_v24  ;;  %v1703_v63 = vld [vmem:[%s2339_s1 + $0x2f4] ss:$8 sps:$4 sm:$0xff]   ;;  %v1706_v1 = vld [vmem:[%s2339_s1 + $0x2f0] ss:$8 sps:$4 sm:$0xff]   ;;  %v1718_v3 = vld [vmem:[%s2339_s1 + $0x304] ss:$8 sps:$4 sm:$0xff]  }
  0x1d   : > { %1210 = vmatprep.subr.bf16.mxu0 %v1649_v25  ;;  %v1707_v4 = vld [vmem:[%s2020_s13] ss:$36 sps:$4 sm:$0xff]   ;;  %v1713_v6 = vld [vmem:[%s2020_s13 + $0x10] ss:$36 sps:$4 sm:$0xff]  }
  0x1e   : > { %v1710_v5 = vld [vmem:[%s2339_s1 + $0x100] ss:$8 sps:$4 sm:$0xff]   ;;  %v1721_v8 = vld [vmem:[%s2339_s1 + $0x114] ss:$8 sps:$4 sm:$0xff]   ;;  %v1719_v10 = vld [vmem:[%s2339_s1 + $0x110] ss:$8 sps:$4 sm:$0xff]  }
  0x1f   : > { %1125 = vmatpush1.bf16.msra.mxu1 %v1651_v26  ;;  %v1716_v7 = vld [vmem:[%s2339_s1 + $0x300] ss:$8 sps:$4 sm:$0xff]   ;;  %v1724_v9 = vld [vmem:[%s2339_s1 + $0x314] ss:$8 sps:$4 sm:$0xff]   ;;  %v1722_v11 = vld [vmem:[%s2339_s1 + $0x310] ss:$8 sps:$4 sm:$0xff]  }
  0x20   : > { %1211 = vmatpush1.bf16.msra.mxu0 %v1652_v27  ;;  %1126 = vmatprep.subr.bf16.mxu1 %v1653_v28  ;;  %v1727_v12 = vld [vmem:[%s2339_s1 + $0x124] ss:$8 sps:$4 sm:$0xff]   ;;  %v1725_v14 = vld [vmem:[%s2339_s1 + $0x120] ss:$8 sps:$4 sm:$0xff]   ;;  %v1733_v16 = vld [vmem:[%s2339_s1 + $0x134] ss:$8 sps:$4 sm:$0xff]  }
  0x21   : > { %1212 = vmatprep.subr.bf16.mxu0 %v1655_v29  ;;  %v1730_v13 = vld [vmem:[%s2339_s1 + $0x324] ss:$8 sps:$4 sm:$0xff]   ;;  %v1728_v15 = vld [vmem:[%s2339_s1 + $0x320] ss:$8 sps:$4 sm:$0xff]   ;;  %v1736_v17 = vld [vmem:[%s2339_s1 + $0x334] ss:$8 sps:$4 sm:$0xff]  }
  0x22   : > { %v1731_v18 = vld [vmem:[%s2339_s1 + $0x130] ss:$8 sps:$4 sm:$0xff]   ;;  %v1739_v20 = vld [vmem:[%s2339_s1 + $0x144] ss:$8 sps:$4 sm:$0xff]   ;;  %v1737_v22 = vld [vmem:[%s2339_s1 + $0x140] ss:$8 sps:$4 sm:$0xff]  }
  0x23   : > { %1127 = vmatpush1.bf16.msra.mxu1 %v1657_v30  ;;  %v1734_v19 = vld [vmem:[%s2339_s1 + $0x330] ss:$8 sps:$4 sm:$0xff]   ;;  %v1742_v21 = vld [vmem:[%s2339_s1 + $0x344] ss:$8 sps:$4 sm:$0xff]   ;;  %v1740_v23 = vld [vmem:[%s2339_s1 + $0x340] ss:$8 sps:$4 sm:$0xff]  }
  0x24   : > { %1213 = vmatpush1.bf16.msra.mxu0 %v1658_v31  ;;  %1128 = vmatprep.subr.bf16.mxu1 %v1659_v32  ;;  %v1745_v24 = vld [vmem:[%s2339_s1 + $0x154] ss:$8 sps:$4 sm:$0xff]   ;;  %v1743_v26 = vld [vmem:[%s2339_s1 + $0x150] ss:$8 sps:$4 sm:$0xff]   ;;  %v1751_v28 = vld [vmem:[%s2339_s1 + $0x164] ss:$8 sps:$4 sm:$0xff]  }
  0x25   : > { %1214 = vmatprep.subr.bf16.mxu0 %v1661_v33  ;;  %v1748_v25 = vld [vmem:[%s2339_s1 + $0x354] ss:$8 sps:$4 sm:$0xff]   ;;  %v1746_v27 = vld [vmem:[%s2339_s1 + $0x350] ss:$8 sps:$4 sm:$0xff]   ;;  %v1754_v29 = vld [vmem:[%s2339_s1 + $0x364] ss:$8 sps:$4 sm:$0xff]  }
  0x26   : > { %v1749_v30 = vld [vmem:[%s2339_s1 + $0x160] ss:$8 sps:$4 sm:$0xff]   ;;  %v1757_v32 = vld [vmem:[%s2339_s1 + $0x174] ss:$8 sps:$4 sm:$0xff]  }
  0x27   : > { %1129 = vmatpush1.bf16.msra.mxu1 %v1663_v34  ;;  %v1752_v31 = vld [vmem:[%s2339_s1 + $0x360] ss:$8 sps:$4 sm:$0xff]   ;;  %v1760_v33 = vld [vmem:[%s2339_s1 + $0x374] ss:$8 sps:$4 sm:$0xff]   ;;  %v1811_v34 = vld [vmem:[%s2020_s13 + $0xc] ss:$36 sps:$4 sm:$0xff]  }
  0x28   : > { %1215 = vmatpush1.bf16.msra.mxu0 %v1664_v35  ;;  %1130 = vmatprep.subr.bf16.mxu1 %v1665_v36  ;;  %v1814_v35 = vld [vmem:[%s2020_s13 + $0x1c] ss:$36 sps:$4 sm:$0xff]   ;;  %v1755_v36 = vld [vmem:[%s2339_s1 + $0x170] ss:$8 sps:$4 sm:$0xff]  }
  0x29   : > { %1216 = vmatprep.subr.bf16.mxu0 %v1667_v37  ;;  %v1758_v37 = vld [vmem:[%s2339_s1 + $0x370] ss:$8 sps:$4 sm:$0xff]   ;;  %v1773_v48 = vld [vmem:[%s2339_s1 + $0x1a0] ss:$8 sps:$4 sm:$0xff]   ;;  %v1784_v51 = vld [vmem:[%s2339_s1 + $0x3b4] ss:$8 sps:$4 sm:$0xff]  }
  0x2b   : > { %1131 = vmatpush1.bf16.msra.mxu1 %v1669_v38  ;;  %v1763_v38 = vld [vmem:[%s2339_s1 + $0x184] ss:$8 sps:$4 sm:$0xff]  }
  0x2c   : > { %1217 = vmatpush1.bf16.msra.mxu0 %v1670_v39  ;;  %1132 = vmatprep.subr.bf16.mxu1 %v1671_v40  ;;  %v1766_v39 = vld [vmem:[%s2339_s1 + $0x384] ss:$8 sps:$4 sm:$0xff]   ;;  %v1761_v40 = vld [vmem:[%s2339_s1 + $0x180] ss:$8 sps:$4 sm:$0xff]  }
  0x2d   : > { %1218 = vmatprep.subr.bf16.mxu0 %v1673_v41  ;;  %v1764_v41 = vld [vmem:[%s2339_s1 + $0x380] ss:$8 sps:$4 sm:$0xff]  }
  0x2f   : > { %1133 = vmatpush1.bf16.msra.mxu1 %v1675_v42  ;;  %v1769_v42 = vld [vmem:[%s2339_s1 + $0x194] ss:$8 sps:$4 sm:$0xff]  }
  0x30   : > { %1219 = vmatpush1.bf16.msra.mxu0 %v1676_v43  ;;  %1134 = vmatprep.subr.bf16.mxu1 %v1677_v44  ;;  %v1772_v43 = vld [vmem:[%s2339_s1 + $0x394] ss:$8 sps:$4 sm:$0xff]   ;;  %v1767_v44 = vld [vmem:[%s2339_s1 + $0x190] ss:$8 sps:$4 sm:$0xff]  }
  0x31   : > { %1220 = vmatprep.subr.bf16.mxu0 %v1679_v45  ;;  %v1770_v45 = vld [vmem:[%s2339_s1 + $0x390] ss:$8 sps:$4 sm:$0xff]  }
  0x33   : > { %1135 = vmatpush1.bf16.msra.mxu1 %v1681_v46  ;;  %v1775_v46 = vld [vmem:[%s2339_s1 + $0x1a4] ss:$8 sps:$4 sm:$0xff]  }
  0x34   : > { %1221 = vmatpush1.bf16.msra.mxu0 %v1682_v47  ;;  %1136 = vmatprep.subr.bf16.mxu1 %v1683_v49  ;;  %v1778_v47 = vld [vmem:[%s2339_s1 + $0x3a4] ss:$8 sps:$4 sm:$0xff]   ;;  %v1776_v49 = vld [vmem:[%s2339_s1 + $0x3a0] ss:$8 sps:$4 sm:$0xff]  }
  0x35   : > { %1222 = vmatprep.subr.bf16.mxu0 %v1685_v50  ;;  %v1781_v50 = vld [vmem:[%s2339_s1 + $0x1b4] ss:$8 sps:$4 sm:$0xff]  }
  0x37   : > { %1137 = vmatpush1.bf16.msra.mxu1 %v1687_v52  ;;  %v1779_v52 = vld [vmem:[%s2339_s1 + $0x1b0] ss:$8 sps:$4 sm:$0xff]  }
  0x38   : > { %1223 = vmatpush1.bf16.msra.mxu0 %v1688_v53  ;;  %1138 = vmatprep.subr.bf16.mxu1 %v1689_v54  ;;  %v1782_v53 = vld [vmem:[%s2339_s1 + $0x3b0] ss:$8 sps:$4 sm:$0xff]   ;;  %v1787_v54 = vld [vmem:[%s2339_s1 + $0x1c4] ss:$8 sps:$4 sm:$0xff]  }
  0x39   : > { %1224 = vmatprep.subr.bf16.mxu0 %v1691_v55  ;;  %v1790_v55 = vld [vmem:[%s2339_s1 + $0x3c4] ss:$8 sps:$4 sm:$0xff]  }
  0x3b   : > { %1139 = vmatpush1.bf16.msra.mxu1 %v1693_v56  ;;  %v1785_v56 = vld [vmem:[%s2339_s1 + $0x1c0] ss:$8 sps:$4 sm:$0xff]  }
  0x3c   : > { %1225 = vmatpush1.bf16.msra.mxu0 %v1694_v57  ;;  %1140 = vmatprep.subr.bf16.mxu1 %v1695_v58  ;;  %v1788_v57 = vld [vmem:[%s2339_s1 + $0x3c0] ss:$8 sps:$4 sm:$0xff]   ;;  %v1793_v58 = vld [vmem:[%s2339_s1 + $0x1d4] ss:$8 sps:$4 sm:$0xff]  }
  0x3d   : > { %1226 = vmatprep.subr.bf16.mxu0 %v1697_v59  ;;  %v1796_v59 = vld [vmem:[%s2339_s1 + $0x3d4] ss:$8 sps:$4 sm:$0xff]  }
  0x3f   : > { %1141 = vmatpush1.bf16.msra.mxu1 %v1699_v60  ;;  %v1791_v60 = vld [vmem:[%s2339_s1 + $0x1d0] ss:$8 sps:$4 sm:$0xff]  }
  0x40   : > { %1227 = vmatpush1.bf16.msra.mxu0 %v1700_v61  ;;  %1142 = vmatprep.subr.bf16.mxu1 %v1701_v62  ;;  %v1794_v61 = vld [vmem:[%s2339_s1 + $0x3d0] ss:$8 sps:$4 sm:$0xff]   ;;  %v1799_v62 = vld [vmem:[%s2339_s1 + $0x1e4] ss:$8 sps:$4 sm:$0xff]  }
  0x41   : > { %1228 = vmatprep.subr.bf16.mxu0 %v1703_v63  ;;  %v1802_v63 = vld [vmem:[%s2339_s1 + $0x3e4] ss:$8 sps:$4 sm:$0xff]  }
  0x43   : > { %1143 = vmatpush1.bf16.msra.mxu1 %v1705_v0  ;;  %v1797_v0 = vld [vmem:[%s2339_s1 + $0x1e0] ss:$8 sps:$4 sm:$0xff]  }
  0x44   : > { %1229 = vmatpush1.bf16.msra.mxu0 %v1706_v1  ;;  %1155 = vmatprep.subr.bf16.mxu1 %v1712_v2  ;;  %v1800_v1 = vld [vmem:[%s2339_s1 + $0x3e0] ss:$8 sps:$4 sm:$0xff]   ;;  %v1805_v2 = vld [vmem:[%s2339_s1 + $0x1f4] ss:$8 sps:$4 sm:$0xff]  }
  0x45   : > { %1241 = vmatprep.subr.bf16.mxu0 %v1718_v3  ;;  %v1808_v3 = vld [vmem:[%s2339_s1 + $0x3f4] ss:$8 sps:$4 sm:$0xff]  }
  0x46   : > { %1145 = vmatmul.mubr.bf16.vlgmr.msra.gmra.mrb[0].mxu1 %v1707_v4  ;;  %v1803_v4 = vld [vmem:[%s2339_s1 + $0x1f0] ss:$8 sps:$4 sm:$0xff]  }
  0x47   : > { %1231 = vmatmul.mubr.bf16.vlgmr.msra.gmra.mrb[0].mxu0 %v1713_v6  ;;  %1156 = vmatpush1.bf16.msra.mxu1 %v1710_v5  ;;  %v1806_v5 = vld [vmem:[%s2339_s1 + $0x3f0] ss:$8 sps:$4 sm:$0xff]   ;;  %v1817_v6 = vld [vmem:[%s2339_s1 + $0x404] ss:$8 sps:$4 sm:$0xff]  }
  0x48   : > { %1242 = vmatpush1.bf16.msra.mxu0 %v1716_v7  ;;  %1157 = vmatprep.subr.bf16.mxu1 %v1721_v8  ;;  %v1809_v7 = vld [vmem:[%s2020_s13 + $0x8] ss:$36 sps:$4 sm:$0xff]   ;;  %v1812_v8 = vld [vmem:[%s2020_s13 + $0x18] ss:$36 sps:$4 sm:$0xff]  }
  0x49   : > { %1243 = vmatprep.subr.bf16.mxu0 %v1724_v9  ;;  %1187 = vmatprep.mubr.bf16.mxu1 %v1811_v34  ;;  %v1815_v9 = vld [vmem:[%s2339_s1 + $0x400] ss:$8 sps:$4 sm:$0xff]  }
  0x4a   : > { %1273 = vmatprep.mubr.bf16.mxu0 %v1814_v35 }
  0x4b   : > { %1158 = vmatpush1.bf16.msra.mxu1 %v1719_v10  ;;  %v1820_v10 = vld [vmem:[%s2339_s1 + $0x414] ss:$8 sps:$4 sm:$0xff]  }
  0x4c   : > { %1244 = vmatpush1.bf16.msra.mxu0 %v1722_v11  ;;  %1159 = vmatprep.subr.bf16.mxu1 %v1727_v12  ;;  %v1818_v11 = vld [vmem:[%s2339_s1 + $0x410] ss:$8 sps:$4 sm:$0xff]   ;;  %v1848_v12 = vmov 0  }
  0x4d   : > { %1245 = vmatprep.subr.bf16.mxu0 %v1730_v13  ;;  %v1823_v13 = vld [vmem:[%s2339_s1 + $0x424] ss:$8 sps:$4 sm:$0xff]  }
  0x4f   : > { %1160 = vmatpush1.bf16.msra.mxu1 %v1725_v14  ;;  %v1821_v14 = vld [vmem:[%s2339_s1 + $0x420] ss:$8 sps:$4 sm:$0xff]  }
  0x50   : > { %1246 = vmatpush1.bf16.msra.mxu0 %v1728_v15  ;;  %1161 = vmatprep.subr.bf16.mxu1 %v1733_v16  ;;  %v1826_v15 = vld [vmem:[%s2339_s1 + $0x434] ss:$8 sps:$4 sm:$0xff]   ;;  %v1824_v16 = vld [vmem:[%s2339_s1 + $0x430] ss:$8 sps:$4 sm:$0xff]  }
  0x51   : > { %1247 = vmatprep.subr.bf16.mxu0 %v1736_v17  ;;  %v1829_v17 = vld [vmem:[%s2339_s1 + $0x444] ss:$8 sps:$4 sm:$0xff]  }
  0x53   : > { %1162 = vmatpush1.bf16.msra.mxu1 %v1731_v18  ;;  %v1827_v18 = vld [vmem:[%s2339_s1 + $0x440] ss:$8 sps:$4 sm:$0xff]  }
  0x54   : > { %1248 = vmatpush1.bf16.msra.mxu0 %v1734_v19  ;;  %1163 = vmatprep.subr.bf16.mxu1 %v1739_v20  ;;  %v1832_v19 = vld [vmem:[%s2339_s1 + $0x454] ss:$8 sps:$4 sm:$0xff]   ;;  %v1830_v20 = vld [vmem:[%s2339_s1 + $0x450] ss:$8 sps:$4 sm:$0xff]  }
  0x55   : > { %1249 = vmatprep.subr.bf16.mxu0 %v1742_v21  ;;  %v1835_v21 = vld [vmem:[%s2339_s1 + $0x464] ss:$8 sps:$4 sm:$0xff]  }
  0x57   : > { %1164 = vmatpush1.bf16.msra.mxu1 %v1737_v22  ;;  %v1833_v22 = vld [vmem:[%s2339_s1 + $0x460] ss:$8 sps:$4 sm:$0xff]  }
  0x58   : > { %1250 = vmatpush1.bf16.msra.mxu0 %v1740_v23  ;;  %1165 = vmatprep.subr.bf16.mxu1 %v1745_v24  ;;  %v1838_v23 = vld [vmem:[%s2339_s1 + $0x474] ss:$8 sps:$4 sm:$0xff]   ;;  %v1836_v24 = vld [vmem:[%s2339_s1 + $0x470] ss:$8 sps:$4 sm:$0xff]  }
  0x59   : > { %1251 = vmatprep.subr.bf16.mxu0 %v1748_v25  ;;  %v1839_v25 = vld [vmem:[%s2020_s13 + $0x20] ss:$36 sps:$4 sm:$0xff]   ;;  %s1578_s13 = sshll.u32 %s2343_s24, 3 }
  0x5a   : > { %s177_s18 = scalar_lea.vmem %s2341_s3, %s1578_s13 }
  0x5b   : > { %1166 = vmatpush1.bf16.msra.mxu1 %v1743_v26 }
  0x5c   : > { %1252 = vmatpush1.bf16.msra.mxu0 %v1746_v27  ;;  %1167 = vmatprep.subr.bf16.mxu1 %v1751_v28 }
  0x5d   : > { %1253 = vmatprep.subr.bf16.mxu0 %v1754_v29 }
  0x5f   : > { %1168 = vmatpush1.bf16.msra.mxu1 %v1749_v30  ;;  %v336_v30 = vlaneseq }
  0x60   : > { %1254 = vmatpush1.bf16.msra.mxu0 %v1752_v31  ;;  %1169 = vmatprep.subr.bf16.mxu1 %v1757_v32 }
  0x61   : > { %1255 = vmatprep.subr.bf16.mxu0 %v1760_v33  ;;  %v337_v31 = vshrl.u32 %v336_v30, 7  ;;  %v334_v33 = vld [vmem:[%s2340_s2] sm:$0x3] }
  0x63   : > { %1170 = vmatpush1.bf16.msra.mxu1 %v1755_v36  ;;  %v338_v32 = vsub.s32 0, %v337_v31  ;;  %v342_v34 = vsub.s32 1, %v337_v31 }
  0x64   : > { %1256 = vmatpush1.bf16.msra.mxu0 %v1758_v37  ;;  %1171 = vmatprep.subr.bf16.mxu1 %v1763_v38 }
  0x65   : > { %1257 = vmatprep.subr.bf16.mxu0 %v1766_v39  ;;  %v339_v35 = vrot.slane %v334_v33, %v338_v32  ;;  %v343_v36 = vrot.slane %v334_v33, %v342_v34 }
  0x67   : > { %1172 = vmatpush1.bf16.msra.mxu1 %v1761_v40 }
  0x68   : > { %1258 = vmatpush1.bf16.msra.mxu0 %v1764_v41  ;;  %1173 = vmatprep.subr.bf16.mxu1 %v1769_v42 }
  0x69   : > { %1259 = vmatprep.subr.bf16.mxu0 %v1772_v43 }
  0x6b   : > { %1174 = vmatpush1.bf16.msra.mxu1 %v1767_v44 }
  0x6c   : > { %1260 = vmatpush1.bf16.msra.mxu0 %v1770_v45  ;;  %1175 = vmatprep.subr.bf16.mxu1 %v1775_v46 }
  0x6d   : > { %1261 = vmatprep.subr.bf16.mxu0 %v1778_v47 }
  0x6f   : > { %1176 = vmatpush1.bf16.msra.mxu1 %v1773_v48 }
  0x70   : > { %1262 = vmatpush1.bf16.msra.mxu0 %v1776_v49  ;;  %1177 = vmatprep.subr.bf16.mxu1 %v1781_v50 }
  0x71   : > { %1263 = vmatprep.subr.bf16.mxu0 %v1784_v51 }
  0x73   : > { %1178 = vmatpush1.bf16.msra.mxu1 %v1779_v52 }
  0x74   : > { %1264 = vmatpush1.bf16.msra.mxu0 %v1782_v53  ;;  %1179 = vmatprep.subr.bf16.mxu1 %v1787_v54 }
  0x75   : > { %1265 = vmatprep.subr.bf16.mxu0 %v1790_v55 }
  0x77   : > { %1180 = vmatpush1.bf16.msra.mxu1 %v1785_v56 }
  0x78   : > { %1266 = vmatpush1.bf16.msra.mxu0 %v1788_v57  ;;  %1181 = vmatprep.subr.bf16.mxu1 %v1793_v58 }
  0x79   : > { %1267 = vmatprep.subr.bf16.mxu0 %v1796_v59 }
  0x7b   : > { %1182 = vmatpush1.bf16.msra.mxu1 %v1791_v60 }
  0x7c   : > { %1268 = vmatpush1.bf16.msra.mxu0 %v1794_v61  ;;  %1183 = vmatprep.subr.bf16.mxu1 %v1799_v62 }
  0x7d   : > { %1269 = vmatprep.subr.bf16.mxu0 %v1802_v63 }
  0x7f   : > { %1184 = vmatpush1.bf16.msra.mxu1 %v1797_v0 }
  0x80   : > { %1270 = vmatpush1.bf16.msra.mxu0 %v1800_v1  ;;  %1185 = vmatprep.subr.bf16.mxu1 %v1805_v2 }
  0x81   : > { %1271 = vmatprep.subr.bf16.mxu0 %v1808_v3 }
  0x83   : > { %1186 = vmatpush1.bf16.msra.mxu1 %v1803_v4 }
  0x84   : > { %1272 = vmatpush1.bf16.msra.mxu0 %v1806_v5 }
  0x85   : > { %1284 = vmatprep.subr.bf16.mxu0 %v1817_v6 }
  0x86   : > { %1188 = vmatmul.mubr.bf16.vlgmr.msra.gmra.mrb[0].mxu1 %v1809_v7 }
  0x87   : > { %1274 = vmatmul.mubr.bf16.vlgmr.msra.gmra.mrb[0].mxu0 %v1812_v8 }
  0x88   : > { %1285 = vmatpush1.bf16.msra.mxu0 %v1815_v9  ;;  %1316 = vmatprep.mubr.bf16.mxu0 %v1848_v12 }
  0x89   : > { %1286 = vmatprep.subr.bf16.mxu0 %v1820_v10 }
  0x8c   : > { %1287 = vmatpush1.bf16.msra.mxu0 %v1818_v11 }
  0x8d   : > { %1288 = vmatprep.subr.bf16.mxu0 %v1823_v13 }
  0x90   : > { %1289 = vmatpush1.bf16.msra.mxu0 %v1821_v14 }
  0x91   : > { %1290 = vmatprep.subr.bf16.mxu0 %v1826_v15 }
  0x94   : > { %1291 = vmatpush1.bf16.msra.mxu0 %v1824_v16 }
  0x95   : > { %1292 = vmatprep.subr.bf16.mxu0 %v1829_v17 }
  0x98   : > { %1293 = vmatpush1.bf16.msra.mxu0 %v1827_v18 }
  0x99   : > { %1294 = vmatprep.subr.bf16.mxu0 %v1832_v19 }
  0x9c   : > { %1295 = vmatpush1.bf16.msra.mxu0 %v1830_v20 }
  0x9d   : > { %1296 = vmatprep.subr.bf16.mxu0 %v1835_v21 }
  0xa0   : > { %1297 = vmatpush1.bf16.msra.mxu0 %v1833_v22 }
  0xa1   : > { %1298 = vmatprep.subr.bf16.mxu0 %v1838_v23 }
  0xa4   : > { %1299 = vmatpush1.bf16.msra.mxu0 %v1836_v24 }
  0xa7   : > { %1317 = vmatmul.mubr.bf16.vlgmr.msra.gmra.mrb[0].mxu0 %v1839_v25 }
 0x159   : > { %v1189_v26 = vpop.f32.mrb[0].mxu1 }
 0x15a   : > { %v1191_v27 = vpop.f32.mrb[1].mxu1  ;;  %v1581_v37 = vadd.f32 %v1189_v26, %v339_v35 }
 0x15b   : > { %v1193_v28 = vpop.f32.mrb[2].mxu1  ;;  %v1583_v38 = vadd.f32 %v1191_v27, %v343_v36 }
 0x15c   : > { %v1195_v29 = vpop.f32.mrb[3].mxu1  ;;  %v1585_v40 = vadd.f32 %v1193_v28, %v339_v35 }
 0x15d   : > { %v1587_v43 = vadd.f32 %v1195_v29, %v343_v36 }
 0x17a   : > { %v1318_v39 = vpop.f32.mrb[0].mxu0 }
 0x17b   : > { %v1582_v41 = vadd.f32 %v1581_v37, %v1318_v39  ;;  %v1320_v42 = vpop.f32.mrb[1].mxu0 }
 0x17c   : > { %v1584_v44 = vadd.f32 %v1583_v38, %v1320_v42  ;;  %v1322_v45 = vpop.f32.mrb[2].mxu0 }
 0x17d   : > { %vm1327_vm0 = vcmp.ge.f32.partialorder %v1582_v41, 0.0  ;;  %v1331_v46 = vmul.f32 0.01, %v1582_v41  ;;  %v1586_v47 = vadd.f32 %v1585_v40, %v1322_v45  ;;  %v1324_v48 = vpop.f32.mrb[3].mxu0 }
 0x17e   : > { %vm1328_vm1 = vcmp.ge.f32.partialorder %v1584_v44, 0.0  ;;  %v1332_v49 = vmul.f32 0.01, %v1584_v44  ;;  %v1588_v50 = vadd.f32 %v1587_v43, %v1324_v48 }
 0x17f   : > { %v1335_v51 = vsel %vm1327_vm0, %v1582_v41, %v1331_v46  ;;  %vm1329_vm2 = vcmp.ge.f32.partialorder %v1586_v47, 0.0  ;;  %v1333_v52 = vmul.f32 0.01, %v1586_v47 }
 0x180   : > { %v1336_v53 = vsel %vm1328_vm1, %v1584_v44, %v1332_v49  ;;  %vm1330_vm3 = vcmp.ge.f32.partialorder %v1588_v50, 0.0  ;;  %v1334_v54 = vmul.f32 0.01, %v1588_v50 }
 0x181   : > { %v1579_v55 = vpack.c.bf16 %v1336_v53, %v1335_v51  ;;  %v1337_v56 = vsel %vm1329_vm2, %v1586_v47, %v1333_v52 }
 0x182   : > { %v1338_v57 = vsel %vm1330_vm3, %v1588_v50, %v1334_v54 }
 0x183   : > { %1351 = vst [vmem:[%s177_s18] sm:$0xff] %v1579_v55  ;;  %v1580_v58 = vpack.c.bf16 %v1338_v57, %v1337_v56 }
 0x185   : > { %1352 = vst [vmem:[%s177_s18 + $0x8] sm:$0xff] %v1580_v58 }
 0x186 PF: > { %s13_s12 = sadd.s32 1, %s1846_s12  }
 0x187   : > { %p10_p4 = scmp.ge.s32.totalorder %s13_s12, 4  }
 0x189   :  { %12 = sbr.rel (!%p10_p4) target bundleno = 1 (0x1), region = 62 }

// kernel: discriminator_wgan_forward.7
= control target key start
LH: loop header
LB: loop body
LE: loop exit
PB: predicated region body
PF: predicated region fallthrough
CT: control target
= control target key end

     0   :  { %v132_v0 = vlaneseq  ;;  %vm559_vm0 = vcmask 7168   ;;  %s934_s1 = inlined_call_operand.vmem [shape: bf16[1,4096], index: 1, kind: input, shape index: {}]   ;;  %s935_s0 = inlined_call_operand.vmem [shape: bf16[16,4096], index: 0, kind: input, shape index: {}]   ;;  %s936_s2 = inlined_call_operand.<no memory space> [shape: f32[1,1], index: 2, kind: input, shape index: {}]   ;;  %s937_s3 = inlined_call_operand.vmem [shape: f32[16,1], index: 3, kind: output, shape index: {}]  }
   0x1   :  { %v112_v2 = vld [vmem:[%s934_s1] sm:$0xff]  ;;  %v17_v13 = vld [vmem:[%s935_s0 + $0x8] sm:$0xff]  ;;  %v18_v19 = vld [vmem:[%s935_s0 + $0x10] sm:$0xff] }
   0x2   :  { %v133_v1 = vshrl.u32 %v132_v0, 7  ;;  %v116_v3 = vunpack.c.l.bf16 %v112_v2  ;;  %v16_v7 = vld [vmem:[%s935_s0] sm:$0xff]  ;;  %v117_v11 = vunpack.c.h.bf16 %v112_v2  ;;  %v50_v20 = vunpack.c.l.bf16 %v17_v13  ;;  %v113_v24 = vld [vmem:[%s934_s1 + $0x8] sm:$0xff]  ;;  %v19_v30 = vld [vmem:[%s935_s0 + $0x18] sm:$0xff] }
   0x3   :  { %v48_v14 = vunpack.c.l.bf16 %v16_v7  ;;  %v49_v15 = vunpack.c.h.bf16 %v16_v7  ;;  %v51_v23 = vunpack.c.h.bf16 %v17_v13  ;;  %v52_v29 = vunpack.c.l.bf16 %v18_v19  ;;  %v20_v41 = vld [vmem:[%s935_s0 + $0x20] sm:$0xff]  ;;  %v21_v47 = vld [vmem:[%s935_s0 + $0x28] sm:$0xff]  ;;  %v667_v55 = vld [vmem:[%s935_s0 + $0x30] sm:$0xff] }
   0x4   :  { %v590_v4 = vsub.s32 0, %v133_v1  ;;  %v592_v5 = vsub.s32 2, %v133_v1  ;;  %v594_v6 = vsub.s32 4, %v133_v1  ;;  %v601_v10 = vsub.s32 6, %v133_v1  ;;  %v32_v52 = vld [vmem:[%s935_s0 + $0x80] sm:$0xff]  ;;  %v33_v60 = vld [vmem:[%s935_s0 + $0x88] sm:$0xff] }
   0x5   :  { %v118_v31 = vunpack.c.l.bf16 %v113_v24  ;;  %v53_v35 = vunpack.c.h.bf16 %v18_v19  ;;  %v54_v40 = vunpack.c.l.bf16 %v19_v30  ;;  %v55_v46 = vunpack.c.h.bf16 %v19_v30  ;;  %v680_v1 = vld [vmem:[%s935_s0 + $0x38] sm:$0xff] }
   0x6   :  { %v135_v8 = vrot.slane %v116_v3, %v590_v4  ;;  %v139_v9 = vrot.slane %v116_v3, %v592_v5  ;;  %v143_v12 = vrot.slane %v116_v3, %v594_v6  ;;  %v147_v16 = vrot.slane %v116_v3, %v601_v10 }
   0x7   :  { %v151_v21 = vrot.slane %v117_v11, %v590_v4  ;;  %v155_v25 = vrot.slane %v117_v11, %v592_v5  ;;  %v159_v32 = vrot.slane %v117_v11, %v594_v6  ;;  %v163_v36 = vrot.slane %v117_v11, %v601_v10 }
   0x8   :  { %v609_v17 = vrot.slane %v135_v8, %v590_v4  ;;  %v612_v18 = vrot.slane %v139_v9, %v590_v4  ;;  %v619_v22 = vrot.slane %v143_v12, %v590_v4  ;;  %v626_v26 = vrot.slane %v147_v16, %v590_v4 }
   0x9   :  { %v635_v33 = vrot.slane %v151_v21, %v590_v4  ;;  %v640_v37 = vrot.slane %v155_v25, %v590_v4  ;;  %v167_v42 = vrot.slane %v118_v31, %v590_v4  ;;  %v648_v43 = vrot.slane %v159_v32, %v590_v4  ;;  %v34_v21 = vld [vmem:[%s935_s0 + $0x90] sm:$0xff] }
   0xa   :  { %v420_v27 = vmul.f32 %v609_v17, %v48_v14  ;;  %v421_v28 = vmul.f32 %v612_v18, %v49_v15  ;;  %v422_v34 = vmul.f32 %v619_v22, %v50_v20  ;;  %v423_v38 = vmul.f32 %v626_v26, %v51_v23  ;;  %v114_v14 = vld [vmem:[%s934_s1 + $0x10] sm:$0xff] }
   0xb   :  { %v424_v44 = vmul.f32 %v635_v33, %v52_v29  ;;  %v171_v48 = vrot.slane %v118_v31, %v592_v5  ;;  %v656_v49 = vrot.slane %v163_v36, %v590_v4  ;;  %v425_v50 = vmul.f32 %v640_v37, %v53_v35 }
   0xc   :  { %v484_v39 = vadd.f32 %v421_v28, %v420_v27  ;;  %v56_v53 = vunpack.c.l.bf16 %v20_v41  ;;  %v662_v54 = vunpack.c.h.bf16 %v113_v24  ;;  %v175_v56 = vrot.slane %v118_v31, %v594_v6  ;;  %v707_v28 = vld [vmem:[%s935_s0 + $0x40] sm:$0xff] }
   0xd   :  { %v671_v57 = vrot.slane %v167_v42, %v590_v4  ;;  %v426_v58 = vmul.f32 %v648_v43, %v54_v40  ;;  %v57_v61 = vunpack.c.h.bf16 %v20_v41  ;;  %v58_v62 = vunpack.c.l.bf16 %v21_v47  ;;  %v35_v41 = vld [vmem:[%s935_s0 + $0x98] sm:$0xff] }
   0xe   :  { %v485_v45 = vadd.f32 %v484_v39, %v422_v34  ;;  %v80_v63 = vunpack.c.l.bf16 %v32_v52  ;;  %v81_v0 = vunpack.c.h.bf16 %v32_v52  ;;  %v179_v2 = vrot.slane %v118_v31, %v601_v10 }
   0xf   :  { %v684_v3 = vrot.slane %v171_v48, %v590_v4  ;;  %v427_v7 = vmul.f32 %v656_v49, %v55_v46  ;;  %v59_v9 = vunpack.c.h.bf16 %v21_v47  ;;  %v60_v11 = vunpack.c.l.bf16 %v667_v55 }
  0x10   :  { %v486_v51 = vadd.f32 %v485_v45, %v423_v38  ;;  %v61_v12 = vunpack.c.h.bf16 %v667_v55  ;;  %v82_v13 = vunpack.c.l.bf16 %v33_v60  ;;  %v183_v15 = vrot.slane %v662_v54, %v590_v4 }
  0x11   :  { %v695_v16 = vrot.slane %v175_v56, %v590_v4  ;;  %v428_v19 = vmul.f32 %v671_v57, %v56_v53  ;;  %v62_v23 = vunpack.c.l.bf16 %v680_v1  ;;  %v83_v24 = vunpack.c.h.bf16 %v33_v60  ;;  %v36_v60 = vld [vmem:[%s935_s0 + $0xa0] sm:$0xff] }
  0x12   :  { %v487_v59 = vadd.f32 %v486_v51, %v424_v44  ;;  %v452_v25 = vmul.f32 %v609_v17, %v80_v63  ;;  %v453_v27 = vmul.f32 %v612_v18, %v81_v0  ;;  %v187_v29 = vrot.slane %v662_v54, %v592_v5 }
  0x13   :  { %v712_v30 = vrot.slane %v179_v2, %v590_v4  ;;  %v429_v31 = vmul.f32 %v684_v3, %v57_v61  ;;  %v63_v34 = vunpack.c.h.bf16 %v680_v1  ;;  %v716_v35 = vunpack.c.l.bf16 %v114_v14 }
  0x14   :  { %v488_v8 = vadd.f32 %v487_v59, %v425_v50  ;;  %v84_v17 = vunpack.c.l.bf16 %v34_v21  ;;  %v454_v18 = vmul.f32 %v619_v22, %v82_v13  ;;  %v191_v36 = vrot.slane %v662_v54, %v594_v6  ;;  %v733_v22 = vld [vmem:[%s935_s0 + $0x48] sm:$0xff] }
  0x15   :  { %v722_v38 = vrot.slane %v183_v15, %v590_v4  ;;  %v430_v39 = vmul.f32 %v695_v16, %v58_v62  ;;  %v64_v42 = vunpack.c.l.bf16 %v707_v28  ;;  %v85_v44 = vunpack.c.h.bf16 %v34_v21 }
  0x16   :  { %v489_v20 = vadd.f32 %v488_v8, %v426_v58  ;;  %v455_v45 = vmul.f32 %v626_v26, %v83_v24  ;;  %v517_v46 = vadd.f32 %v453_v27, %v452_v25  ;;  %v195_v47 = vrot.slane %v662_v54, %v601_v10 }
  0x17   :  { %v738_v48 = vrot.slane %v187_v29, %v590_v4  ;;  %v431_v50 = vmul.f32 %v712_v30, %v59_v9  ;;  %v65_v52 = vunpack.c.h.bf16 %v707_v28  ;;  %v86_v53 = vunpack.c.l.bf16 %v35_v41 }
  0x18   :  { %v490_v32 = vadd.f32 %v489_v20, %v427_v7  ;;  %v456_v26 = vmul.f32 %v635_v33, %v84_v17  ;;  %v518_v55 = vadd.f32 %v517_v46, %v454_v18  ;;  %v199_v56 = vrot.slane %v716_v35, %v590_v4  ;;  %v27_v46 = vld [vmem:[%s935_s0 + $0x58] sm:$0xff] }
  0x19   :  { %v746_v58 = vrot.slane %v191_v36, %v590_v4  ;;  %v432_v54 = vmul.f32 %v722_v38, %v60_v11  ;;  %v66_v61 = vunpack.c.l.bf16 %v733_v22  ;;  %v87_v62 = vunpack.c.h.bf16 %v35_v41 }
  0x1a   :  { %v491_v40 = vadd.f32 %v490_v32, %v428_v19  ;;  %v457_v63 = vmul.f32 %v640_v37, %v85_v44  ;;  %v519_v33 = vadd.f32 %v518_v55, %v455_v45  ;;  %v203_v0 = vrot.slane %v716_v35, %v592_v5  ;;  %v766_v37 = vld [vmem:[%s935_s0 + $0x50] sm:$0xff] }
  0x1b   :  { %v757_v1 = vrot.slane %v195_v47, %v590_v4  ;;  %v433_v2 = vmul.f32 %v738_v48, %v61_v12  ;;  %v760_v8 = vunpack.c.h.bf16 %v114_v14  ;;  %v88_v9 = vunpack.c.l.bf16 %v36_v60  ;;  %v37_v14 = vld [vmem:[%s935_s0 + $0xa8] sm:$0xff] }
  0x1c   :  { %v492_v51 = vadd.f32 %v491_v40, %v429_v31  ;;  %v458_v11 = vmul.f32 %v648_v43, %v86_v53  ;;  %v520_v13 = vadd.f32 %v519_v33, %v456_v26  ;;  %v207_v15 = vrot.slane %v716_v35, %v594_v6  ;;  %v38_v40 = vld [vmem:[%s935_s0 + $0xb0] sm:$0xff] }
  0x1d   :  { %v771_v19 = vrot.slane %v199_v56, %v590_v4  ;;  %v434_v12 = vmul.f32 %v746_v58, %v62_v23  ;;  %v67_v43 = vunpack.c.h.bf16 %v733_v22  ;;  %v89_v21 = vunpack.c.h.bf16 %v36_v60 }
  0x1e   :  { %v493_v59 = vadd.f32 %v492_v51, %v430_v39  ;;  %v459_v24 = vmul.f32 %v656_v49, %v87_v62  ;;  %v521_v25 = vadd.f32 %v520_v13, %v457_v63  ;;  %v211_v27 = vrot.slane %v716_v35, %v601_v10  ;;  %v115_v49 = vld [vmem:[%s934_s1 + $0x18] sm:$0xff] }
  0x1f   :  { %v782_v28 = vrot.slane %v203_v0, %v590_v4  ;;  %v435_v29 = vmul.f32 %v757_v1, %v63_v34  ;;  %v68_v31 = vunpack.c.l.bf16 %v766_v37  ;;  %v90_v32 = vunpack.c.l.bf16 %v37_v14 }
  0x20   :  { %v494_v7 = vadd.f32 %v493_v59, %v431_v50  ;;  %v460_v17 = vmul.f32 %v671_v57, %v88_v9  ;;  %v522_v18 = vadd.f32 %v521_v25, %v458_v11  ;;  %v215_v36 = vrot.slane %v760_v8, %v590_v4 }
  0x21   :  { %v793_v35 = vrot.slane %v207_v15, %v590_v4  ;;  %v436_v39 = vmul.f32 %v771_v19, %v64_v42  ;;  %v69_v57 = vunpack.c.h.bf16 %v766_v37  ;;  %v91_v41 = vunpack.c.h.bf16 %v37_v14 }
  0x22   :  { %v495_v20 = vadd.f32 %v494_v7, %v432_v54  ;;  %v461_v44 = vmul.f32 %v684_v3, %v89_v21  ;;  %v523_v45 = vadd.f32 %v522_v18, %v459_v24  ;;  %v219_v22 = vrot.slane %v760_v8, %v592_v5 }
  0x23   :  { %v807_v42 = vrot.slane %v211_v27, %v590_v4  ;;  %v437_v47 = vmul.f32 %v782_v28, %v65_v52  ;;  %v810_v51 = vunpack.c.l.bf16 %v115_v49  ;;  %v92_v53 = vunpack.c.l.bf16 %v38_v40  ;;  %v39_v52 = vld [vmem:[%s935_s0 + $0xb8] sm:$0xff] }
  0x24   :  { %v496_v23 = vadd.f32 %v495_v20, %v433_v2  ;;  %v462_v26 = vmul.f32 %v695_v16, %v90_v32  ;;  %v524_v3 = vadd.f32 %v523_v45, %v460_v17  ;;  %v223_v55 = vrot.slane %v760_v8, %v594_v6  ;;  %v28_v16 = vld [vmem:[%s935_s0 + $0x60] sm:$0xff] }
  0x25   :  { %v816_v56 = vrot.slane %v215_v36, %v590_v4  ;;  %v438_v54 = vmul.f32 %v793_v35, %v66_v61  ;;  %v70_v60 = vunpack.c.l.bf16 %v27_v46  ;;  %v93_v62 = vunpack.c.h.bf16 %v38_v40  ;;  %v40_v20 = vld [vmem:[%s935_s0 + $0xc0] sm:$0xff] }
  0x26   :  { %v497_v34 = vadd.f32 %v496_v23, %v434_v12  ;;  %v463_v63 = vmul.f32 %v712_v30, %v91_v41  ;;  %v525_v33 = vadd.f32 %v524_v3, %v461_v44  ;;  %v227_v0 = vrot.slane %v760_v8, %v601_v10  ;;  %v30_v3 = vld [vmem:[%s935_s0 + $0x70] sm:$0xff] }
  0x27   :  { %v829_v2 = vrot.slane %v219_v22, %v590_v4  ;;  %v439_v61 = vmul.f32 %v807_v42, %v67_v43  ;;  %v71_v9 = vunpack.c.h.bf16 %v27_v46  ;;  %v94_v11 = vunpack.c.l.bf16 %v39_v52 }
  0x28   :  { %v498_v50 = vadd.f32 %v497_v34, %v435_v29  ;;  %v464_v13 = vmul.f32 %v722_v38, %v92_v53  ;;  %v526_v37 = vadd.f32 %v525_v33, %v462_v26  ;;  %v231_v30 = vrot.slane %v810_v51, %v590_v4 }
  0x29   :  { %v836_v15 = vrot.slane %v223_v55, %v590_v4  ;;  %v440_v12 = vmul.f32 %v816_v56, %v68_v31  ;;  %v72_v14 = vunpack.c.l.bf16 %v28_v16  ;;  %v95_v43 = vunpack.c.h.bf16 %v39_v52 }
  0x2a   :  { %v499_v59 = vadd.f32 %v498_v50, %v436_v39  ;;  %v465_v21 = vmul.f32 %v738_v48, %v93_v62  ;;  %v527_v24 = vadd.f32 %v526_v37, %v463_v63  ;;  %v235_v38 = vrot.slane %v810_v51, %v592_v5  ;;  %v29_v48 = vld [vmem:[%s935_s0 + $0x68] sm:$0xff] }
  0x2b   :  { %v846_v25 = vrot.slane %v227_v0, %v590_v4  ;;  %v441_v27 = vmul.f32 %v829_v2, %v69_v57  ;;  %v849_v23 = vunpack.c.h.bf16 %v115_v49  ;;  %v96_v31 = vunpack.c.l.bf16 %v40_v20  ;;  %v41_v49 = vld [vmem:[%s935_s0 + $0xc8] sm:$0xff] }
  0x2c   :  { %v500_v7 = vadd.f32 %v499_v59, %v437_v47  ;;  %v466_v32 = vmul.f32 %v746_v58, %v94_v11  ;;  %v528_v17 = vadd.f32 %v527_v24, %v464_v13  ;;  %v239_v18 = vrot.slane %v810_v51, %v594_v6  ;;  %v42_v59 = vld [vmem:[%s935_s0 + $0xd0] sm:$0xff] }
  0x2d   :  { %v858_v36 = vrot.slane %v231_v30, %v590_v4  ;;  %v442_v39 = vmul.f32 %v836_v15, %v70_v60  ;;  %v73_v40 = vunpack.c.h.bf16 %v28_v16  ;;  %v97_v58 = vunpack.c.h.bf16 %v40_v20 }
  0x2e   :  { %v501_v8 = vadd.f32 %v500_v7, %v438_v54  ;;  %v467_v57 = vmul.f32 %v757_v1, %v95_v43  ;;  %v529_v41 = vadd.f32 %v528_v17, %v465_v21  ;;  %v243_v44 = vrot.slane %v810_v51, %v601_v10 }
  0x2f   :  { %v868_v45 = vrot.slane %v235_v38, %v590_v4  ;;  %v443_v46 = vmul.f32 %v846_v25, %v71_v9  ;;  %v74_v47 = vunpack.c.l.bf16 %v29_v48  ;;  %v98_v50 = vunpack.c.l.bf16 %v41_v49 }
  0x30   :  { %v502_v29 = vadd.f32 %v501_v8, %v439_v61  ;;  %v468_v53 = vmul.f32 %v771_v19, %v96_v31  ;;  %v530_v26 = vadd.f32 %v529_v41, %v466_v32  ;;  %v247_v1 = vrot.slane %v849_v23, %v590_v4 }
  0x31   :  { %v878_v51 = vrot.slane %v239_v18, %v590_v4  ;;  %v444_v55 = vmul.f32 %v858_v36, %v72_v14  ;;  %v75_v52 = vunpack.c.h.bf16 %v29_v48  ;;  %v99_v19 = vunpack.c.h.bf16 %v41_v49 }
  0x32   :  { %v503_v34 = vadd.f32 %v502_v29, %v440_v12  ;;  %v469_v60 = vmul.f32 %v782_v28, %v97_v58  ;;  %v531_v62 = vadd.f32 %v530_v26, %v467_v57  ;;  %v251_v63 = vrot.slane %v849_v23, %v592_v5  ;;  %v43_v5 = vld [vmem:[%s935_s0 + $0xd8] sm:$0xff] }
  0x33   :  { %v403_v33 = vrot.slane %v243_v44, %v590_v4  ;;  %v445_v16 = vmul.f32 %v868_v45, %v73_v40  ;;  %v76_v61 = vunpack.c.l.bf16 %v30_v3  ;;  %v100_v7 = vunpack.c.l.bf16 %v42_v59  ;;  %v31_v12 = vld [vmem:[%s935_s0 + $0x78] sm:$0xff] }
  0x34   :  { %v504_v22 = vadd.f32 %v503_v34, %v441_v27  ;;  %v470_v9 = vmul.f32 %v793_v35, %v98_v50  ;;  %v532_v11 = vadd.f32 %v531_v62, %v468_v53  ;;  %v255_v13 = vrot.slane %v849_v23, %v594_v6 }
  0x35   :  { %v407_v37 = vrot.slane %v247_v1, %v590_v4  ;;  %v446_v28 = vmul.f32 %v878_v51, %v74_v47  ;;  %v77_v8 = vunpack.c.h.bf16 %v30_v3  ;;  %v101_v20 = vunpack.c.h.bf16 %v42_v59 }
  0x36   :  { %v505_v54 = vadd.f32 %v504_v22, %v442_v39  ;;  %v471_v35 = vmul.f32 %v807_v42, %v99_v19  ;;  %v533_v14 = vadd.f32 %v532_v11, %v469_v60  ;;  %v259_v6 = vrot.slane %v849_v23, %v601_v10  ;;  %v44_v42 = vld [vmem:[%s935_s0 + $0xe0] sm:$0xff] }
  0x37   :  { %v411_v43 = vrot.slane %v251_v63, %v590_v4  ;;  %v447_v21 = vmul.f32 %v403_v33, %v75_v52  ;;  %v102_v38 = vunpack.c.l.bf16 %v43_v5  ;;  %v472_v27 = vmul.f32 %v816_v56, %v100_v7 }
  0x38   :  { %v506_v0 = vadd.f32 %v505_v54, %v443_v46  ;;  %v534_v29 = vadd.f32 %v533_v14, %v470_v9  ;;  %v78_v31 = vunpack.c.l.bf16 %v31_v12  ;;  %v415_v32 = vrot.slane %v255_v13, %v590_v4  ;;  %v45_v46 = vld [vmem:[%s935_s0 + $0xe8] sm:$0xff] }
  0x39   :  { %v448_v17 = vmul.f32 %v407_v37, %v76_v61  ;;  %v103_v18 = vunpack.c.h.bf16 %v43_v5  ;;  %v473_v10 = vmul.f32 %v829_v2, %v101_v20  ;;  %v79_v39 = vunpack.c.h.bf16 %v31_v12 }
  0x3a   :  { %v507_v30 = vadd.f32 %v506_v0, %v444_v55  ;;  %v535_v23 = vadd.f32 %v534_v29, %v471_v35  ;;  %v419_v34 = vrot.slane %v259_v6, %v590_v4  ;;  %v449_v49 = vmul.f32 %v411_v43, %v77_v8 }
  0x3b   :  { %v104_v56 = vunpack.c.l.bf16 %v44_v42  ;;  %v474_v58 = vmul.f32 %v836_v15, %v102_v38  ;;  %v450_v41 = vmul.f32 %v415_v32, %v78_v31  ;;  %v105_v22 = vunpack.c.h.bf16 %v44_v42  ;;  %v46_v15 = vld [vmem:[%s935_s0 + $0xf0] sm:$0xff] }
  0x3c   :  { %v508_v24 = vadd.f32 %v507_v30, %v445_v16  ;;  %v536_v57 = vadd.f32 %v535_v23, %v472_v27  ;;  %v475_v47 = vmul.f32 %v846_v25, %v103_v18  ;;  %v451_v50 = vmul.f32 %v419_v34, %v79_v39 }
  0x3d   :  { %v106_v26 = vunpack.c.l.bf16 %v45_v46  ;;  %v476_v4 = vmul.f32 %v858_v36, %v104_v56  ;;  %v107_v55 = vunpack.c.h.bf16 %v45_v46  ;;  %v477_v54 = vmul.f32 %v868_v45, %v105_v22  ;;  %v47_v36 = vld [vmem:[%s935_s0 + $0xf8] sm:$0xff] }
  0x3e   :  { %v509_v48 = vadd.f32 %v508_v24, %v446_v28  ;;  %v537_v2 = vadd.f32 %v536_v57, %v473_v10  ;;  %v108_v19 = vunpack.c.l.bf16 %v46_v15  ;;  %v109_v62 = vunpack.c.h.bf16 %v46_v15 }
  0x3f   :  { %v478_v25 = vmul.f32 %v878_v51, %v106_v26  ;;  %v479_v63 = vmul.f32 %v403_v33, %v107_v55  ;;  %v110_v0 = vunpack.c.l.bf16 %v47_v36  ;;  %v111_v9 = vunpack.c.h.bf16 %v47_v36 }
  0x40   :  { %v510_v40 = vadd.f32 %v509_v48, %v447_v21  ;;  %v538_v3 = vadd.f32 %v537_v2, %v474_v58  ;;  %v480_v61 = vmul.f32 %v407_v37, %v108_v19  ;;  %v481_v11 = vmul.f32 %v411_v43, %v109_v62 }
  0x41   :  { %v482_v13 = vmul.f32 %v415_v32, %v110_v0  ;;  %v483_v30 = vmul.f32 %v419_v34, %v111_v9  ;;  %v8_v8 = vstv %s936_s2 }
  0x42   :  { %v511_v44 = vadd.f32 %v510_v40, %v448_v17  ;;  %v539_v59 = vadd.f32 %v538_v3, %v475_v47  ;;  %9 = vst [vmem:[#allocation2] sm:$0x1] %v8_v8 }
  0x44   :  { %v512_v53 = vadd.f32 %v511_v44, %v449_v49  ;;  %v540_v60 = vadd.f32 %v539_v59, %v476_v4 }
  0x46   :  { %v513_v1 = vadd.f32 %v512_v53, %v450_v41  ;;  %v541_v16 = vadd.f32 %v540_v60, %v477_v54 }
  0x48   :  { %v514_v52 = vadd.f32 %v513_v1, %v451_v50  ;;  %v542_v7 = vadd.f32 %v541_v16, %v478_v25 }
  0x49   :  { %v566_v33 = vld [vmem:[#allocation2] ss:$0 sm:$0xff] }
  0x4a   :  { %515 = vadd.xlane.f32.xlu0 %v514_v52  ;;  %v543_v45 = vadd.f32 %v542_v7, %v479_v63 }
  0x4c   :  { %v544_v28 = vadd.f32 %v543_v45, %v480_v61 }
  0x4e   :  { %v545_v5 = vadd.f32 %v544_v28, %v481_v11 }
  0x50   :  { %v546_v51 = vadd.f32 %v545_v5, %v482_v13 }
  0x52   :  { %v547_v12 = vadd.f32 %v546_v51, %v483_v30 }
  0x54   :  { %548 = vadd.xlane.f32.xlu0 %v547_v12 }
  0xd7   :  { %v516_v20 = vpop.xlane.xlu0 %515 }
  0xd8   :  { %v557_v37 = vadd.f32 %v566_v33, %v516_v20 }
  0xda   :  { %560 = vst.msk [vmem:[%s937_s3] sm:$0xff] %vm559_vm0, %v557_v37 }
  0xe1   :  { %v549_v35 = vpop.xlane.xlu0 %548 }
  0xe2   :  { %v558_v14 = vadd.f32 %v566_v33, %v549_v35 }
  0xe4   :  { %561 = vst.msk [vmem:[%s937_s3 + $0x8] sm:$0xff] %vm559_vm0, %v558_v14 }

</bundles_post_ra>
